<compile_context>
chip_gen: v7x
topology: tpu7x:2x2x1
jax: 0.10.0
libtpu: 0.0.40
codegen_flags: <defaults>
</compile_context>

<pallas_src>
import functools

import jax
import jax.numpy as jnp
from jax.experimental import pallas as pl
from jax.experimental.pallas import tpu as pltpu


def _mha_kernel(xq_ref, xk_ref, xv_ref, wqt_ref, wkt_ref, wvt_ref, wpt_ref,
                bp_ref, o_ref, att_ref, *, num_heads, dk, causal, q_tile):
    bf16 = jnp.bfloat16

    xq = xq_ref[0]                      # (TQ, D) bf16
    xk = xk_ref[0]                      # (L,  D) bf16
    xv = xv_ref[0]                      # (L,  D) bf16

    # QKV projections: bf16 MXU operands, f32 accumulation.  The 1/sqrt(dk)
    # scale is pre-folded into Wq^T in the wrapper.
    q_all = jnp.dot(xq, wqt_ref[...],
                    preferred_element_type=jnp.float32).astype(bf16)    # (TQ, D)
    k_all = jnp.dot(xk, wkt_ref[...],
                    preferred_element_type=jnp.float32).astype(bf16)    # (L, D)
    v_all = jnp.dot(xv, wvt_ref[...],
                    preferred_element_type=jnp.float32).astype(bf16)    # (L, D)

    tq = q_all.shape[0]
    seq = k_all.shape[0]

    if causal:
        q0 = pl.program_id(1) * q_tile
        row = jax.lax.broadcasted_iota(jnp.int32, (tq, seq), 0) + q0
        col = jax.lax.broadcasted_iota(jnp.int32, (tq, seq), 1)
        neg = jnp.where(col > row, jnp.float32(-1e13), jnp.float32(0.0))

    nt_dims = (((1,), (1,)), ((), ()))  # contract last dims: q @ k^T, no transpose

    for h in range(num_heads):          # static unroll (small head count)
        lo = h * dk
        qh = q_all[:, lo:lo + dk]       # (TQ, dk) bf16
        kh = k_all[:, lo:lo + dk]       # (L,  dk) bf16
        vh = v_all[:, lo:lo + dk]       # (L,  dk) bf16

        # NT score matmul with f32 accumulation.
        s = jax.lax.dot_general(qh, kh, nt_dims,
                                preferred_element_type=jnp.float32)     # (TQ, L)
        if causal:
            s = s + neg

        # Numerically stable softmax in f32; normalization deferred until after
        # the PV matmul and done with an approx EUP reciprocal.
        m = jnp.max(s, axis=-1, keepdims=True)
        e = jnp.exp(s - m)
        r = jnp.sum(e, axis=-1, keepdims=True)
        pv = jnp.dot(e.astype(bf16), vh,
                     preferred_element_type=jnp.float32)                # (TQ, dk)
        att_ref[:, lo:lo + dk] = (pv * pl.reciprocal(r, approx=True)).astype(bf16)

    # "Concat heads + output projection" as ONE dense (TQ,D)x(D,D) MXU matmul.
    out = jnp.dot(att_ref[...], wpt_ref[...],
                  preferred_element_type=jnp.float32)
    o_ref[0] = (out + bp_ref[...]).astype(o_ref.dtype)


def multi_head_attention(query_data, key_data, value_data,
                         wq, wk, wv, wp, bp, *, dk, mask, q_tile=None):
    """query/key/value_data: (B, L, D) f32; wq/wk/wv/wp: (D, D) PyTorch Linear
    weights (out, in); bp: (D,) projection bias. Returns (B, L, D) f32."""
    B, L, D = query_data.shape
    assert D % dk == 0
    num_heads = D // dk
    bf16, f32 = jnp.bfloat16, jnp.float32

    # Query-axis tile: full L for short sequences, 256-row tiles otherwise.
    if q_tile is None:
        q_tile = 256 if (L > 256 and L % 256 == 0) else L
    assert L % q_tile == 0
    n_q_tiles = L // q_tile

    # bf16 MXU operands; fold the 1/sqrt(dk) softmax scale into Wq^T once.
    scale = 1.0 / (float(dk) ** 0.5)
    wqt = (wq.T * scale).astype(bf16)
    wkt = wk.T.astype(bf16)
    wvt = wv.T.astype(bf16)
    wpt = wp.T.astype(bf16)
    bp2 = bp.reshape(1, D).astype(f32)
    xq = query_data.astype(bf16)
    xk = key_data.astype(bf16)
    xv = value_data.astype(bf16)

    kernel = functools.partial(_mha_kernel, num_heads=num_heads, dk=dk,
                               causal=bool(mask), q_tile=q_tile)

    # VMEM budget: weights (double-buffered worst case) + activation blocks +
    # output block + att scratch + score temporaries, with 2x headroom,
    # floored at the default 32 MiB and capped at 64 MiB (safe on v5e/v6e/v7x).
    working_set = (
        4 * D * D * 2 * 2                     # 4 bf16 weight mats
        + D * 4 * 2                           # f32 bias
        + (q_tile * D + 2 * L * D) * 2 * 2    # q tile + K + V (bf16, dbl-buf)
        + q_tile * D * 4 * 2                  # f32 output block (dbl-buf)
        + q_tile * D * 2                      # bf16 att scratch
        + 4 * q_tile * L * 4                  # f32 scores / exp / mask temps
    )
    vmem_limit = int(min(max(2 * working_set, 32 * 1024 * 1024),
                         64 * 1024 * 1024))

    def _build(weight_pipeline_mode):
        wkwargs = ({} if weight_pipeline_mode is None
                   else {"pipeline_mode": weight_pipeline_mode})
        w_spec = lambda: pl.BlockSpec((D, D), lambda b, qi: (0, 0), **wkwargs)
        grid_spec = pltpu.PrefetchScalarGridSpec(
            num_scalar_prefetch=0,
            grid=(B, n_q_tiles),
            in_specs=[
                pl.BlockSpec((1, q_tile, D), lambda b, qi: (b, qi, 0)),  # x_q tile
                pl.BlockSpec((1, L, D), lambda b, qi: (b, 0, 0)),        # x_k full
                pl.BlockSpec((1, L, D), lambda b, qi: (b, 0, 0)),        # x_v full
                w_spec(),                                                # Wq^T*scale
                w_spec(),                                                # Wk^T
                w_spec(),                                                # Wv^T
                w_spec(),                                                # Wp^T
                pl.BlockSpec((1, D), lambda b, qi: (0, 0)),              # bias
            ],
            out_specs=pl.BlockSpec((1, q_tile, D), lambda b, qi: (b, qi, 0)),
            scratch_shapes=[pltpu.VMEM((q_tile, D), bf16)],              # concat heads
        )
        return pl.pallas_call(
            kernel,
            out_shape=jax.ShapeDtypeStruct((B, L, D), f32),
            grid_spec=grid_spec,
            compiler_params=pltpu.CompilerParams(
                dimension_semantics=("parallel", "parallel"),
                vmem_limit_bytes=vmem_limit,
            ),
        )

    args = (xq, xk, xv, wqt, wkt, wvt, wpt, bp2)
    try:
        # Constant-index weight blocks need only a single buffer (saves VMEM,
        # important on v7x's 64 MiB).
        return _build(pl.Buffered(1))(*args)
    except Exception:
        # Fallback: default double buffering if this JAX build rejects
        # pipeline_mode on the top-level pallas_call pipeline.
        return _build(None)(*args)


if __name__ == "__main__":
    # Small deterministic setup consistent with the module's __init__.
    d_model = 32
    dk_model = 8          # -> 4 heads
    max_len = 8
    batch_size = 2
    MASK = True

    key = jax.random.PRNGKey(0)
    k1, k2, k3, k4, k5, k6, k7, k8 = jax.random.split(key, 8)

    # nn.Linear weights are (out_features, in_features); y = x @ W^T (+ b).
    limit = 1.0 / (d_model ** 0.5)
    wq = jax.random.uniform(k1, (d_model, d_model), jnp.float32, -limit, limit)
    wk = jax.random.uniform(k2, (d_model, d_model), jnp.float32, -limit, limit)
    wv = jax.random.uniform(k3, (d_model, d_model), jnp.float32, -limit, limit)
    wp = jax.random.uniform(k4, (d_model, d_model), jnp.float32, -limit, limit)
    bp = jax.random.uniform(k5, (d_model,), jnp.float32, -limit, limit)

    q_in = jax.random.normal(k6, (batch_size, max_len, d_model), jnp.float32)
    k_in = jax.random.normal(k7, (batch_size, max_len, d_model), jnp.float32)
    v_in = jax.random.normal(k8, (batch_size, max_len, d_model), jnp.float32)

    out = multi_head_attention(q_in, k_in, v_in, wq, wk, wv, wp, bp,
                               dk=dk_model, mask=MASK)
    out = jax.block_until_ready(out)

    # Pure-JAX f32 reference mirroring the PyTorch forward (dropout = identity).
    def ref_fn(xq, xk, xv):
        H = d_model // dk_model
        q = (xq @ wq.T).reshape(batch_size, max_len, H, dk_model).transpose(0, 2, 1, 3)
        kk = (xk @ wk.T).reshape(batch_size, max_len, H, dk_model).transpose(0, 2, 1, 3)
        vv = (xv @ wv.T).reshape(batch_size, max_len, H, dk_model).transpose(0, 2, 1, 3)
        s = jnp.einsum("bhqd,bhkd->bhqk", q, kk) / (dk_model ** 0.5)
        if MASK:
            s = s + jnp.triu(jnp.ones_like(s), k=1) * jnp.float32(-1e13)
        p = jax.nn.softmax(s, axis=-1)
        o = jnp.einsum("bhqk,bhkd->bhqd", p, vv)
        o = o.transpose(0, 2, 1, 3).reshape(batch_size, max_len, d_model)
        return o @ wp.T + bp

    ref = ref_fn(q_in, k_in, v_in)
    assert out.shape == (batch_size, max_len, d_model)
    # Tolerance loosened vs. the pure-f32 version: the kernel feeds bf16
    # operands to the MXU (f32 accumulation) and uses an approx reciprocal.
    err = float(jnp.max(jnp.abs(out - ref)))
    assert jnp.allclose(out, ref, atol=5e-2, rtol=5e-2), f"max abs err = {err}"

    print("KERNEL_OK")
</pallas_src>

<mosaic_0001>
module attributes {stable_mosaic.version = 11 : i64} {
  func.func @_mha_kernel(%arg0: i32, %arg1: i32, %arg2: memref<1x8x32xbf16, #tpu.memory_space<vmem>>, %arg3: memref<1x8x32xbf16, #tpu.memory_space<vmem>>, %arg4: memref<1x8x32xbf16, #tpu.memory_space<vmem>>, %arg5: memref<32x32xbf16, #tpu.memory_space<vmem>>, %arg6: memref<32x32xbf16, #tpu.memory_space<vmem>>, %arg7: memref<32x32xbf16, #tpu.memory_space<vmem>>, %arg8: memref<32x32xbf16, #tpu.memory_space<vmem>>, %arg9: memref<1x32xf32, #tpu.memory_space<vmem>>, %arg10: memref<1x8x32xf32, #tpu.memory_space<vmem>>, %arg11: memref<8x32xbf16, #tpu.memory_space<vmem>>) attributes {dimension_semantics = [#tpu.dimension_semantics<parallel>, #tpu.dimension_semantics<parallel>], iteration_bounds = array<i64: 2, 1>, scalar_prefetch = 0 : i64, scratch_operands = 1 : i64, tpu.core_type = #tpu.core_type<tc>, window_params = [{transform_indices = @transform_0, window_bounds = array<i64: 1, 8, 32>}, {transform_indices = @transform_1, window_bounds = array<i64: 1, 8, 32>}, {transform_indices = @transform_2, window_bounds = array<i64: 1, 8, 32>}, {pipeline_mode = #tpu.pipeline_mode<synchronous>, transform_indices = @transform_3, window_bounds = array<i64: 32, 32>}, {pipeline_mode = #tpu.pipeline_mode<synchronous>, transform_indices = @transform_4, window_bounds = array<i64: 32, 32>}, {pipeline_mode = #tpu.pipeline_mode<synchronous>, transform_indices = @transform_5, window_bounds = array<i64: 32, 32>}, {pipeline_mode = #tpu.pipeline_mode<synchronous>, transform_indices = @transform_6, window_bounds = array<i64: 32, 32>}, {pipeline_mode = #tpu.pipeline_mode<synchronous>, transform_indices = @transform_7, window_bounds = array<i64: 1, 32>}, {transform_indices = @transform_8, window_bounds = array<i64: 1, 8, 32>}]} {
    %c0 = arith.constant 0 : index
    %c0_0 = arith.constant 0 : index
    %c0_1 = arith.constant 0 : index
    %0 = vector.load %arg2[%c0, %c0_0, %c0_1] : memref<1x8x32xbf16, #tpu.memory_space<vmem>>, vector<1x8x32xbf16>
    %1 = vector.shape_cast %0 : vector<1x8x32xbf16> to vector<8x32xbf16>
    %c0_2 = arith.constant 0 : index
    %c0_3 = arith.constant 0 : index
    %c0_4 = arith.constant 0 : index
    %2 = vector.load %arg3[%c0_2, %c0_3, %c0_4] : memref<1x8x32xbf16, #tpu.memory_space<vmem>>, vector<1x8x32xbf16>
    %3 = vector.shape_cast %2 : vector<1x8x32xbf16> to vector<8x32xbf16>
    %c0_5 = arith.constant 0 : index
    %c0_6 = arith.constant 0 : index
    %c0_7 = arith.constant 0 : index
    %4 = vector.load %arg4[%c0_5, %c0_6, %c0_7] : memref<1x8x32xbf16, #tpu.memory_space<vmem>>, vector<1x8x32xbf16>
    %5 = vector.shape_cast %4 : vector<1x8x32xbf16> to vector<8x32xbf16>
    %c0_8 = arith.constant 0 : index
    %c0_9 = arith.constant 0 : index
    %6 = vector.load %arg5[%c0_8, %c0_9] : memref<32x32xbf16, #tpu.memory_space<vmem>>, vector<32x32xbf16>
    %cst = arith.constant dense<0.000000e+00> : vector<8x32xf32>
    %7 = tpu.matmul %1, %6, %cst {dimension_numbers = #tpu.dot_dimension_numbers<[1], [0], [0], [1], [0, 0, 1, 1], [], []>} : vector<8x32xbf16>, vector<32x32xbf16>, vector<8x32xf32> -> vector<8x32xf32>
    %8 = arith.truncf %7 : vector<8x32xf32> to vector<8x32xbf16>
    %c0_10 = arith.constant 0 : index
    %c0_11 = arith.constant 0 : index
    %9 = vector.load %arg6[%c0_10, %c0_11] : memref<32x32xbf16, #tpu.memory_space<vmem>>, vector<32x32xbf16>
    %cst_12 = arith.constant dense<0.000000e+00> : vector<8x32xf32>
    %10 = tpu.matmul %3, %9, %cst_12 {dimension_numbers = #tpu.dot_dimension_numbers<[1], [0], [0], [1], [0, 0, 1, 1], [], []>} : vector<8x32xbf16>, vector<32x32xbf16>, vector<8x32xf32> -> vector<8x32xf32>
    %11 = arith.truncf %10 : vector<8x32xf32> to vector<8x32xbf16>
    %c0_13 = arith.constant 0 : index
    %c0_14 = arith.constant 0 : index
    %12 = vector.load %arg7[%c0_13, %c0_14] : memref<32x32xbf16, #tpu.memory_space<vmem>>, vector<32x32xbf16>
    %cst_15 = arith.constant dense<0.000000e+00> : vector<8x32xf32>
    %13 = tpu.matmul %5, %12, %cst_15 {dimension_numbers = #tpu.dot_dimension_numbers<[1], [0], [0], [1], [0, 0, 1, 1], [], []>} : vector<8x32xbf16>, vector<32x32xbf16>, vector<8x32xf32> -> vector<8x32xf32>
    %14 = arith.truncf %13 : vector<8x32xf32> to vector<8x32xbf16>
    %c8_i32 = arith.constant 8 : i32
    %15 = arith.muli %arg1, %c8_i32 : i32
    %16 = tpu.iota {dimensions = array<i32: 0>} : vector<8x8xi32>
    %17 = vector.broadcast %15 : i32 to vector<8x8xi32>
    %18 = arith.addi %16, %17 : vector<8x8xi32>
    %19 = tpu.iota {dimensions = array<i32: 1>} : vector<8x8xi32>
    %20 = arith.cmpi sgt, %19, %18 : vector<8x8xi32>
    %cst_16 = arith.constant -9.99999982E+12 : f32
    %cst_17 = arith.constant 0.000000e+00 : f32
    %21 = vector.broadcast %cst_16 : f32 to vector<8x8xf32>
    %22 = vector.broadcast %cst_17 : f32 to vector<8x8xf32>
    %23 = arith.select %20, %21, %22 : vector<8x8xi1>, vector<8x8xf32>
    %24 = vector.extract_strided_slice %8 {offsets = [0, 0], sizes = [8, 8], strides = [1, 1]} : vector<8x32xbf16> to vector<8x8xbf16>
    %25 = vector.extract_strided_slice %11 {offsets = [0, 0], sizes = [8, 8], strides = [1, 1]} : vector<8x32xbf16> to vector<8x8xbf16>
    %26 = vector.extract_strided_slice %14 {offsets = [0, 0], sizes = [8, 8], strides = [1, 1]} : vector<8x32xbf16> to vector<8x8xbf16>
    %cst_18 = arith.constant dense<0.000000e+00> : vector<8x8xf32>
    %27 = tpu.matmul %24, %25, %cst_18 {dimension_numbers = #tpu.dot_dimension_numbers<[1], [1], [0], [0], [0, 0, 1, 0], [], []>} : vector<8x8xbf16>, vector<8x8xbf16>, vector<8x8xf32> -> vector<8x8xf32>
    %28 = arith.addf %27, %23 : vector<8x8xf32>
    %cst_19 = arith.constant dense<0xFF800000> : vector<8xf32>
    %29 = vector.multi_reduction <maximumf>, %28, %cst_19 [1] : vector<8x8xf32> to vector<8xf32>
    %30 = vector.shape_cast %29 : vector<8xf32> to vector<8x1xf32>
    %31 = vector.broadcast %30 : vector<8x1xf32> to vector<8x8xf32>
    %32 = arith.subf %28, %31 : vector<8x8xf32>
    %33 = math.exp %32 : vector<8x8xf32>
    %cst_20 = arith.constant dense<0.000000e+00> : vector<8xf32>
    %34 = vector.multi_reduction <add>, %33, %cst_20 [1] : vector<8x8xf32> to vector<8xf32>
    %35 = vector.shape_cast %34 : vector<8xf32> to vector<8x1xf32>
    %36 = arith.truncf %33 : vector<8x8xf32> to vector<8x8xbf16>
    %cst_21 = arith.constant dense<0.000000e+00> : vector<8x8xf32>
    %37 = tpu.matmul %36, %26, %cst_21 {dimension_numbers = #tpu.dot_dimension_numbers<[1], [0], [0], [1], [0, 0, 1, 1], [], []>} : vector<8x8xbf16>, vector<8x8xbf16>, vector<8x8xf32> -> vector<8x8xf32>
    %38 = tpu.reciprocal %35 {approx = true} : vector<8x1xf32> -> vector<8x1xf32>
    %39 = vector.broadcast %38 : vector<8x1xf32> to vector<8x8xf32>
    %40 = arith.mulf %37, %39 : vector<8x8xf32>
    %41 = arith.truncf %40 : vector<8x8xf32> to vector<8x8xbf16>
    %c0_22 = arith.constant 0 : index
    %c0_23 = arith.constant 0 : index
    %42 = vector.load %arg11[%c0_22, %c0_23] : memref<8x32xbf16, #tpu.memory_space<vmem>>, vector<8x8xbf16>
    tpu.vector_store %arg11[%c0_22, %c0_23], %41 {strides = array<i32>} : memref<8x32xbf16, #tpu.memory_space<vmem>>, vector<8x8xbf16>,
    %43 = vector.extract_strided_slice %8 {offsets = [0, 8], sizes = [8, 8], strides = [1, 1]} : vector<8x32xbf16> to vector<8x8xbf16>
    %44 = vector.extract_strided_slice %11 {offsets = [0, 8], sizes = [8, 8], strides = [1, 1]} : vector<8x32xbf16> to vector<8x8xbf16>
    %45 = vector.extract_strided_slice %14 {offsets = [0, 8], sizes = [8, 8], strides = [1, 1]} : vector<8x32xbf16> to vector<8x8xbf16>
    %cst_24 = arith.constant dense<0.000000e+00> : vector<8x8xf32>
    %46 = tpu.matmul %43, %44, %cst_24 {dimension_numbers = #tpu.dot_dimension_numbers<[1], [1], [0], [0], [0, 0, 1, 0], [], []>} : vector<8x8xbf16>, vector<8x8xbf16>, vector<8x8xf32> -> vector<8x8xf32>
    %47 = arith.addf %46, %23 : vector<8x8xf32>
    %cst_25 = arith.constant dense<0xFF800000> : vector<8xf32>
    %48 = vector.multi_reduction <maximumf>, %47, %cst_25 [1] : vector<8x8xf32> to vector<8xf32>
    %49 = vector.shape_cast %48 : vector<8xf32> to vector<8x1xf32>
    %50 = vector.broadcast %49 : vector<8x1xf32> to vector<8x8xf32>
    %51 = arith.subf %47, %50 : vector<8x8xf32>
    %52 = math.exp %51 : vector<8x8xf32>
    %cst_26 = arith.constant dense<0.000000e+00> : vector<8xf32>
    %53 = vector.multi_reduction <add>, %52, %cst_26 [1] : vector<8x8xf32> to vector<8xf32>
    %54 = vector.shape_cast %53 : vector<8xf32> to vector<8x1xf32>
    %55 = arith.truncf %52 : vector<8x8xf32> to vector<8x8xbf16>
    %cst_27 = arith.constant dense<0.000000e+00> : vector<8x8xf32>
    %56 = tpu.matmul %55, %45, %cst_27 {dimension_numbers = #tpu.dot_dimension_numbers<[1], [0], [0], [1], [0, 0, 1, 1], [], []>} : vector<8x8xbf16>, vector<8x8xbf16>, vector<8x8xf32> -> vector<8x8xf32>
    %57 = tpu.reciprocal %54 {approx = true} : vector<8x1xf32> -> vector<8x1xf32>
    %58 = vector.broadcast %57 : vector<8x1xf32> to vector<8x8xf32>
    %59 = arith.mulf %56, %58 : vector<8x8xf32>
    %60 = arith.truncf %59 : vector<8x8xf32> to vector<8x8xbf16>
    %c0_28 = arith.constant 0 : index
    %c8 = arith.constant 8 : index
    %61 = vector.load %arg11[%c0_28, %c8] : memref<8x32xbf16, #tpu.memory_space<vmem>>, vector<8x8xbf16>
    tpu.vector_store %arg11[%c0_28, %c8], %60 {strides = array<i32>} : memref<8x32xbf16, #tpu.memory_space<vmem>>, vector<8x8xbf16>,
    %62 = vector.extract_strided_slice %8 {offsets = [0, 16], sizes = [8, 8], strides = [1, 1]} : vector<8x32xbf16> to vector<8x8xbf16>
    %63 = vector.extract_strided_slice %11 {offsets = [0, 16], sizes = [8, 8], strides = [1, 1]} : vector<8x32xbf16> to vector<8x8xbf16>
    %64 = vector.extract_strided_slice %14 {offsets = [0, 16], sizes = [8, 8], strides = [1, 1]} : vector<8x32xbf16> to vector<8x8xbf16>
    %cst_29 = arith.constant dense<0.000000e+00> : vector<8x8xf32>
    %65 = tpu.matmul %62, %63, %cst_29 {dimension_numbers = #tpu.dot_dimension_numbers<[1], [1], [0], [0], [0, 0, 1, 0], [], []>} : vector<8x8xbf16>, vector<8x8xbf16>, vector<8x8xf32> -> vector<8x8xf32>
    %66 = arith.addf %65, %23 : vector<8x8xf32>
    %cst_30 = arith.constant dense<0xFF800000> : vector<8xf32>
    %67 = vector.multi_reduction <maximumf>, %66, %cst_30 [1] : vector<8x8xf32> to vector<8xf32>
    %68 = vector.shape_cast %67 : vector<8xf32> to vector<8x1xf32>
    %69 = vector.broadcast %68 : vector<8x1xf32> to vector<8x8xf32>
    %70 = arith.subf %66, %69 : vector<8x8xf32>
    %71 = math.exp %70 : vector<8x8xf32>
    %cst_31 = arith.constant dense<0.000000e+00> : vector<8xf32>
    %72 = vector.multi_reduction <add>, %71, %cst_31 [1] : vector<8x8xf32> to vector<8xf32>
    %73 = vector.shape_cast %72 : vector<8xf32> to vector<8x1xf32>
    %74 = arith.truncf %71 : vector<8x8xf32> to vector<8x8xbf16>
    %cst_32 = arith.constant dense<0.000000e+00> : vector<8x8xf32>
    %75 = tpu.matmul %74, %64, %cst_32 {dimension_numbers = #tpu.dot_dimension_numbers<[1], [0], [0], [1], [0, 0, 1, 1], [], []>} : vector<8x8xbf16>, vector<8x8xbf16>, vector<8x8xf32> -> vector<8x8xf32>
    %76 = tpu.reciprocal %73 {approx = true} : vector<8x1xf32> -> vector<8x1xf32>
    %77 = vector.broadcast %76 : vector<8x1xf32> to vector<8x8xf32>
    %78 = arith.mulf %75, %77 : vector<8x8xf32>
    %79 = arith.truncf %78 : vector<8x8xf32> to vector<8x8xbf16>
    %c0_33 = arith.constant 0 : index
    %c16 = arith.constant 16 : index
    %80 = vector.load %arg11[%c0_33, %c16] : memref<8x32xbf16, #tpu.memory_space<vmem>>, vector<8x8xbf16>
    tpu.vector_store %arg11[%c0_33, %c16], %79 {strides = array<i32>} : memref<8x32xbf16, #tpu.memory_space<vmem>>, vector<8x8xbf16>,
    %81 = vector.extract_strided_slice %8 {offsets = [0, 24], sizes = [8, 8], strides = [1, 1]} : vector<8x32xbf16> to vector<8x8xbf16>
    %82 = vector.extract_strided_slice %11 {offsets = [0, 24], sizes = [8, 8], strides = [1, 1]} : vector<8x32xbf16> to vector<8x8xbf16>
    %83 = vector.extract_strided_slice %14 {offsets = [0, 24], sizes = [8, 8], strides = [1, 1]} : vector<8x32xbf16> to vector<8x8xbf16>
    %cst_34 = arith.constant dense<0.000000e+00> : vector<8x8xf32>
    %84 = tpu.matmul %81, %82, %cst_34 {dimension_numbers = #tpu.dot_dimension_numbers<[1], [1], [0], [0], [0, 0, 1, 0], [], []>} : vector<8x8xbf16>, vector<8x8xbf16>, vector<8x8xf32> -> vector<8x8xf32>
    %85 = arith.addf %84, %23 : vector<8x8xf32>
    %cst_35 = arith.constant dense<0xFF800000> : vector<8xf32>
    %86 = vector.multi_reduction <maximumf>, %85, %cst_35 [1] : vector<8x8xf32> to vector<8xf32>
    %87 = vector.shape_cast %86 : vector<8xf32> to vector<8x1xf32>
    %88 = vector.broadcast %87 : vector<8x1xf32> to vector<8x8xf32>
    %89 = arith.subf %85, %88 : vector<8x8xf32>
    %90 = math.exp %89 : vector<8x8xf32>
    %cst_36 = arith.constant dense<0.000000e+00> : vector<8xf32>
    %91 = vector.multi_reduction <add>, %90, %cst_36 [1] : vector<8x8xf32> to vector<8xf32>
    %92 = vector.shape_cast %91 : vector<8xf32> to vector<8x1xf32>
    %93 = arith.truncf %90 : vector<8x8xf32> to vector<8x8xbf16>
    %cst_37 = arith.constant dense<0.000000e+00> : vector<8x8xf32>
    %94 = tpu.matmul %93, %83, %cst_37 {dimension_numbers = #tpu.dot_dimension_numbers<[1], [0], [0], [1], [0, 0, 1, 1], [], []>} : vector<8x8xbf16>, vector<8x8xbf16>, vector<8x8xf32> -> vector<8x8xf32>
    %95 = tpu.reciprocal %92 {approx = true} : vector<8x1xf32> -> vector<8x1xf32>
    %96 = vector.broadcast %95 : vector<8x1xf32> to vector<8x8xf32>
    %97 = arith.mulf %94, %96 : vector<8x8xf32>
    %98 = arith.truncf %97 : vector<8x8xf32> to vector<8x8xbf16>
    %c0_38 = arith.constant 0 : index
    %c24 = arith.constant 24 : index
    %99 = vector.load %arg11[%c0_38, %c24] : memref<8x32xbf16, #tpu.memory_space<vmem>>, vector<8x8xbf16>
    tpu.vector_store %arg11[%c0_38, %c24], %98 {strides = array<i32>} : memref<8x32xbf16, #tpu.memory_space<vmem>>, vector<8x8xbf16>,
    %c0_39 = arith.constant 0 : index
    %c0_40 = arith.constant 0 : index
    %100 = vector.load %arg11[%c0_39, %c0_40] : memref<8x32xbf16, #tpu.memory_space<vmem>>, vector<8x32xbf16>
    %c0_41 = arith.constant 0 : index
    %c0_42 = arith.constant 0 : index
    %101 = vector.load %arg8[%c0_41, %c0_42] : memref<32x32xbf16, #tpu.memory_space<vmem>>, vector<32x32xbf16>
    %cst_43 = arith.constant dense<0.000000e+00> : vector<8x32xf32>
    %102 = tpu.matmul %100, %101, %cst_43 {dimension_numbers = #tpu.dot_dimension_numbers<[1], [0], [0], [1], [0, 0, 1, 1], [], []>} : vector<8x32xbf16>, vector<32x32xbf16>, vector<8x32xf32> -> vector<8x32xf32>
    %c0_44 = arith.constant 0 : index
    %c0_45 = arith.constant 0 : index
    %103 = vector.load %arg9[%c0_44, %c0_45] : memref<1x32xf32, #tpu.memory_space<vmem>>, vector<1x32xf32>
    %104 = vector.broadcast %103 : vector<1x32xf32> to vector<8x32xf32>
    %105 = arith.addf %102, %104 : vector<8x32xf32>
    %c0_46 = arith.constant 0 : index
    %c0_47 = arith.constant 0 : index
    %c0_48 = arith.constant 0 : index
    %106 = vector.load %arg10[%c0_46, %c0_47, %c0_48] : memref<1x8x32xf32, #tpu.memory_space<vmem>>, vector<1x8x32xf32>
    %107 = vector.shape_cast %106 : vector<1x8x32xf32> to vector<8x32xf32>
    %108 = vector.shape_cast %105 : vector<8x32xf32> to vector<1x8x32xf32>
    tpu.vector_store %arg10[%c0_46, %c0_47, %c0_48], %108 {strides = array<i32>} : memref<1x8x32xf32, #tpu.memory_space<vmem>>, vector<1x8x32xf32>,
    return
  }
  func.func @transform_0(%arg0: i32, %arg1: i32) -> (i32, i32, i32) {
    %c0_i32 = arith.constant 0 : i32
    %c0_i32_0 = arith.constant 0 : i32
    return %arg0, %arg1, %c0_i32 : i32, i32, i32
  }
  func.func @transform_1(%arg0: i32, %arg1: i32) -> (i32, i32, i32) {
    %c0_i32 = arith.constant 0 : i32
    %c0_i32_0 = arith.constant 0 : i32
    %c0_i32_1 = arith.constant 0 : i32
    return %arg0, %c0_i32, %c0_i32_0 : i32, i32, i32
  }
  func.func @transform_2(%arg0: i32, %arg1: i32) -> (i32, i32, i32) {
    %c0_i32 = arith.constant 0 : i32
    %c0_i32_0 = arith.constant 0 : i32
    %c0_i32_1 = arith.constant 0 : i32
    return %arg0, %c0_i32, %c0_i32_0 : i32, i32, i32
  }
  func.func @transform_3(%arg0: i32, %arg1: i32) -> (i32, i32) {
    %c0_i32 = arith.constant 0 : i32
    %c0_i32_0 = arith.constant 0 : i32
    %c0_i32_1 = arith.constant 0 : i32
    return %c0_i32, %c0_i32_0 : i32, i32
  }
  func.func @transform_4(%arg0: i32, %arg1: i32) -> (i32, i32) {
    %c0_i32 = arith.constant 0 : i32
    %c0_i32_0 = arith.constant 0 : i32
    %c0_i32_1 = arith.constant 0 : i32
    return %c0_i32, %c0_i32_0 : i32, i32
  }
  func.func @transform_5(%arg0: i32, %arg1: i32) -> (i32, i32) {
    %c0_i32 = arith.constant 0 : i32
    %c0_i32_0 = arith.constant 0 : i32
    %c0_i32_1 = arith.constant 0 : i32
    return %c0_i32, %c0_i32_0 : i32, i32
  }
  func.func @transform_6(%arg0: i32, %arg1: i32) -> (i32, i32) {
    %c0_i32 = arith.constant 0 : i32
    %c0_i32_0 = arith.constant 0 : i32
    %c0_i32_1 = arith.constant 0 : i32
    return %c0_i32, %c0_i32_0 : i32, i32
  }
  func.func @transform_7(%arg0: i32, %arg1: i32) -> (i32, i32) {
    %c0_i32 = arith.constant 0 : i32
    %c0_i32_0 = arith.constant 0 : i32
    %c0_i32_1 = arith.constant 0 : i32
    return %c0_i32, %c0_i32_0 : i32, i32
  }
  func.func @transform_8(%arg0: i32, %arg1: i32) -> (i32, i32, i32) {
    %c0_i32 = arith.constant 0 : i32
    %c0_i32_0 = arith.constant 0 : i32
    return %arg0, %arg1, %c0_i32 : i32, i32, i32
  }
}

module attributes {stable_mosaic.version = 11 : i64} {
  func.func @_mha_kernel(%arg0: i32, %arg1: i32, %arg2: memref<1x8x32xbf16, #tpu.memory_space<vmem>>, %arg3: memref<1x8x32xbf16, #tpu.memory_space<vmem>>, %arg4: memref<1x8x32xbf16, #tpu.memory_space<vmem>>, %arg5: memref<32x32xbf16, #tpu.memory_space<vmem>>, %arg6: memref<32x32xbf16, #tpu.memory_space<vmem>>, %arg7: memref<32x32xbf16, #tpu.memory_space<vmem>>, %arg8: memref<32x32xbf16, #tpu.memory_space<vmem>>, %arg9: memref<1x32xf32, #tpu.memory_space<vmem>>, %arg10: memref<1x8x32xf32, #tpu.memory_space<vmem>>, %arg11: memref<8x32xbf16, #tpu.memory_space<vmem>>) attributes {dimension_semantics = [#tpu.dimension_semantics<parallel>, #tpu.dimension_semantics<parallel>], iteration_bounds = array<i64: 2, 1>, scalar_prefetch = 0 : i64, scratch_operands = 1 : i64, tpu.core_type = #tpu.core_type<tc>, window_params = [{transform_indices = @transform_0, window_bounds = array<i64: 1, 8, 32>}, {transform_indices = @transform_1, window_bounds = array<i64: 1, 8, 32>}, {transform_indices = @transform_2, window_bounds = array<i64: 1, 8, 32>}, {pipeline_mode = #tpu.pipeline_mode<synchronous>, transform_indices = @transform_3, window_bounds = array<i64: 32, 32>}, {pipeline_mode = #tpu.pipeline_mode<synchronous>, transform_indices = @transform_4, window_bounds = array<i64: 32, 32>}, {pipeline_mode = #tpu.pipeline_mode<synchronous>, transform_indices = @transform_5, window_bounds = array<i64: 32, 32>}, {pipeline_mode = #tpu.pipeline_mode<synchronous>, transform_indices = @transform_6, window_bounds = array<i64: 32, 32>}, {pipeline_mode = #tpu.pipeline_mode<synchronous>, transform_indices = @transform_7, window_bounds = array<i64: 1, 32>}, {transform_indices = @transform_8, window_bounds = array<i64: 1, 8, 32>}]} {
    %c0 = arith.constant 0 : index
    %c0_0 = arith.constant 0 : index
    %c0_1 = arith.constant 0 : index
    %0 = vector.load %arg2[%c0, %c0_0, %c0_1] : memref<1x8x32xbf16, #tpu.memory_space<vmem>>, vector<1x8x32xbf16>
    %1 = vector.shape_cast %0 : vector<1x8x32xbf16> to vector<8x32xbf16>
    %c0_2 = arith.constant 0 : index
    %c0_3 = arith.constant 0 : index
    %c0_4 = arith.constant 0 : index
    %2 = vector.load %arg3[%c0_2, %c0_3, %c0_4] : memref<1x8x32xbf16, #tpu.memory_space<vmem>>, vector<1x8x32xbf16>
    %3 = vector.shape_cast %2 : vector<1x8x32xbf16> to vector<8x32xbf16>
    %c0_5 = arith.constant 0 : index
    %c0_6 = arith.constant 0 : index
    %c0_7 = arith.constant 0 : index
    %4 = vector.load %arg4[%c0_5, %c0_6, %c0_7] : memref<1x8x32xbf16, #tpu.memory_space<vmem>>, vector<1x8x32xbf16>
    %5 = vector.shape_cast %4 : vector<1x8x32xbf16> to vector<8x32xbf16>
    %c0_8 = arith.constant 0 : index
    %c0_9 = arith.constant 0 : index
    %6 = vector.load %arg5[%c0_8, %c0_9] : memref<32x32xbf16, #tpu.memory_space<vmem>>, vector<32x32xbf16>
    %cst = arith.constant dense<0.000000e+00> : vector<8x32xf32>
    %7 = tpu.matmul %1, %6, %cst {dimension_numbers = #tpu.dot_dimension_numbers<[1], [0], [0], [1], [0, 0, 1, 1], [], []>} : vector<8x32xbf16>, vector<32x32xbf16>, vector<8x32xf32> -> vector<8x32xf32>
    %8 = arith.truncf %7 : vector<8x32xf32> to vector<8x32xbf16>
    %c0_10 = arith.constant 0 : index
    %c0_11 = arith.constant 0 : index
    %9 = vector.load %arg6[%c0_10, %c0_11] : memref<32x32xbf16, #tpu.memory_space<vmem>>, vector<32x32xbf16>
    %cst_12 = arith.constant dense<0.000000e+00> : vector<8x32xf32>
    %10 = tpu.matmul %3, %9, %cst_12 {dimension_numbers = #tpu.dot_dimension_numbers<[1], [0], [0], [1], [0, 0, 1, 1], [], []>} : vector<8x32xbf16>, vector<32x32xbf16>, vector<8x32xf32> -> vector<8x32xf32>
    %11 = arith.truncf %10 : vector<8x32xf32> to vector<8x32xbf16>
    %c0_13 = arith.constant 0 : index
    %c0_14 = arith.constant 0 : index
    %12 = vector.load %arg7[%c0_13, %c0_14] : memref<32x32xbf16, #tpu.memory_space<vmem>>, vector<32x32xbf16>
    %cst_15 = arith.constant dense<0.000000e+00> : vector<8x32xf32>
    %13 = tpu.matmul %5, %12, %cst_15 {dimension_numbers = #tpu.dot_dimension_numbers<[1], [0], [0], [1], [0, 0, 1, 1], [], []>} : vector<8x32xbf16>, vector<32x32xbf16>, vector<8x32xf32> -> vector<8x32xf32>
    %14 = arith.truncf %13 : vector<8x32xf32> to vector<8x32xbf16>
    %c8_i32 = arith.constant 8 : i32
    %15 = arith.muli %arg1, %c8_i32 : i32
    %16 = tpu.iota {dimensions = array<i32: 0>} : vector<8x8xi32>
    %17 = vector.broadcast %15 : i32 to vector<8x8xi32>
    %18 = arith.addi %16, %17 : vector<8x8xi32>
    %19 = tpu.iota {dimensions = array<i32: 1>} : vector<8x8xi32>
    %20 = arith.cmpi sgt, %19, %18 : vector<8x8xi32>
    %cst_16 = arith.constant -9.99999982E+12 : f32
    %cst_17 = arith.constant 0.000000e+00 : f32
    %21 = vector.broadcast %cst_16 : f32 to vector<8x8xf32>
    %22 = vector.broadcast %cst_17 : f32 to vector<8x8xf32>
    %23 = arith.select %20, %21, %22 : vector<8x8xi1>, vector<8x8xf32>
    %24 = vector.extract_strided_slice %8 {offsets = [0, 0], sizes = [8, 8], strides = [1, 1]} : vector<8x32xbf16> to vector<8x8xbf16>
    %25 = vector.extract_strided_slice %11 {offsets = [0, 0], sizes = [8, 8], strides = [1, 1]} : vector<8x32xbf16> to vector<8x8xbf16>
    %26 = vector.extract_strided_slice %14 {offsets = [0, 0], sizes = [8, 8], strides = [1, 1]} : vector<8x32xbf16> to vector<8x8xbf16>
    %cst_18 = arith.constant dense<0.000000e+00> : vector<8x8xf32>
    %27 = tpu.matmul %24, %25, %cst_18 {dimension_numbers = #tpu.dot_dimension_numbers<[1], [1], [0], [0], [0, 0, 1, 0], [], []>} : vector<8x8xbf16>, vector<8x8xbf16>, vector<8x8xf32> -> vector<8x8xf32>
    %28 = arith.addf %27, %23 : vector<8x8xf32>
    %cst_19 = arith.constant dense<0xFF800000> : vector<8xf32>
    %29 = vector.multi_reduction <maximumf>, %28, %cst_19 [1] : vector<8x8xf32> to vector<8xf32>
    %30 = vector.shape_cast %29 : vector<8xf32> to vector<8x1xf32>
    %31 = vector.broadcast %30 : vector<8x1xf32> to vector<8x8xf32>
    %32 = arith.subf %28, %31 : vector<8x8xf32>
    %33 = math.exp %32 : vector<8x8xf32>
    %cst_20 = arith.constant dense<0.000000e+00> : vector<8xf32>
    %34 = vector.multi_reduction <add>, %33, %cst_20 [1] : vector<8x8xf32> to vector<8xf32>
    %35 = vector.shape_cast %34 : vector<8xf32> to vector<8x1xf32>
    %36 = arith.truncf %33 : vector<8x8xf32> to vector<8x8xbf16>
    %cst_21 = arith.constant dense<0.000000e+00> : vector<8x8xf32>
    %37 = tpu.matmul %36, %26, %cst_21 {dimension_numbers = #tpu.dot_dimension_numbers<[1], [0], [0], [1], [0, 0, 1, 1], [], []>} : vector<8x8xbf16>, vector<8x8xbf16>, vector<8x8xf32> -> vector<8x8xf32>
    %38 = tpu.reciprocal %35 {approx = true} : vector<8x1xf32> -> vector<8x1xf32>
    %39 = vector.broadcast %38 : vector<8x1xf32> to vector<8x8xf32>
    %40 = arith.mulf %37, %39 : vector<8x8xf32>
    %41 = arith.truncf %40 : vector<8x8xf32> to vector<8x8xbf16>
    %c0_22 = arith.constant 0 : index
    %c0_23 = arith.constant 0 : index
    %42 = vector.load %arg11[%c0_22, %c0_23] : memref<8x32xbf16, #tpu.memory_space<vmem>>, vector<8x8xbf16>
    tpu.vector_store %arg11[%c0_22, %c0_23], %41 {strides = array<i32>} : memref<8x32xbf16, #tpu.memory_space<vmem>>, vector<8x8xbf16>,
    %43 = vector.extract_strided_slice %8 {offsets = [0, 8], sizes = [8, 8], strides = [1, 1]} : vector<8x32xbf16> to vector<8x8xbf16>
    %44 = vector.extract_strided_slice %11 {offsets = [0, 8], sizes = [8, 8], strides = [1, 1]} : vector<8x32xbf16> to vector<8x8xbf16>
    %45 = vector.extract_strided_slice %14 {offsets = [0, 8], sizes = [8, 8], strides = [1, 1]} : vector<8x32xbf16> to vector<8x8xbf16>
    %cst_24 = arith.constant dense<0.000000e+00> : vector<8x8xf32>
    %46 = tpu.matmul %43, %44, %cst_24 {dimension_numbers = #tpu.dot_dimension_numbers<[1], [1], [0], [0], [0, 0, 1, 0], [], []>} : vector<8x8xbf16>, vector<8x8xbf16>, vector<8x8xf32> -> vector<8x8xf32>
    %47 = arith.addf %46, %23 : vector<8x8xf32>
    %cst_25 = arith.constant dense<0xFF800000> : vector<8xf32>
    %48 = vector.multi_reduction <maximumf>, %47, %cst_25 [1] : vector<8x8xf32> to vector<8xf32>
    %49 = vector.shape_cast %48 : vector<8xf32> to vector<8x1xf32>
    %50 = vector.broadcast %49 : vector<8x1xf32> to vector<8x8xf32>
    %51 = arith.subf %47, %50 : vector<8x8xf32>
    %52 = math.exp %51 : vector<8x8xf32>
    %cst_26 = arith.constant dense<0.000000e+00> : vector<8xf32>
    %53 = vector.multi_reduction <add>, %52, %cst_26 [1] : vector<8x8xf32> to vector<8xf32>
    %54 = vector.shape_cast %53 : vector<8xf32> to vector<8x1xf32>
    %55 = arith.truncf %52 : vector<8x8xf32> to vector<8x8xbf16>
    %cst_27 = arith.constant dense<0.000000e+00> : vector<8x8xf32>
    %56 = tpu.matmul %55, %45, %cst_27 {dimension_numbers = #tpu.dot_dimension_numbers<[1], [0], [0], [1], [0, 0, 1, 1], [], []>} : vector<8x8xbf16>, vector<8x8xbf16>, vector<8x8xf32> -> vector<8x8xf32>
    %57 = tpu.reciprocal %54 {approx = true} : vector<8x1xf32> -> vector<8x1xf32>
    %58 = vector.broadcast %57 : vector<8x1xf32> to vector<8x8xf32>
    %59 = arith.mulf %56, %58 : vector<8x8xf32>
    %60 = arith.truncf %59 : vector<8x8xf32> to vector<8x8xbf16>
    %c0_28 = arith.constant 0 : index
    %c8 = arith.constant 8 : index
    %61 = vector.load %arg11[%c0_28, %c8] : memref<8x32xbf16, #tpu.memory_space<vmem>>, vector<8x8xbf16>
    tpu.vector_store %arg11[%c0_28, %c8], %60 {strides = array<i32>} : memref<8x32xbf16, #tpu.memory_space<vmem>>, vector<8x8xbf16>,
    %62 = vector.extract_strided_slice %8 {offsets = [0, 16], sizes = [8, 8], strides = [1, 1]} : vector<8x32xbf16> to vector<8x8xbf16>
    %63 = vector.extract_strided_slice %11 {offsets = [0, 16], sizes = [8, 8], strides = [1, 1]} : vector<8x32xbf16> to vector<8x8xbf16>
    %64 = vector.extract_strided_slice %14 {offsets = [0, 16], sizes = [8, 8], strides = [1, 1]} : vector<8x32xbf16> to vector<8x8xbf16>
    %cst_29 = arith.constant dense<0.000000e+00> : vector<8x8xf32>
    %65 = tpu.matmul %62, %63, %cst_29 {dimension_numbers = #tpu.dot_dimension_numbers<[1], [1], [0], [0], [0, 0, 1, 0], [], []>} : vector<8x8xbf16>, vector<8x8xbf16>, vector<8x8xf32> -> vector<8x8xf32>
    %66 = arith.addf %65, %23 : vector<8x8xf32>
    %cst_30 = arith.constant dense<0xFF800000> : vector<8xf32>
    %67 = vector.multi_reduction <maximumf>, %66, %cst_30 [1] : vector<8x8xf32> to vector<8xf32>
    %68 = vector.shape_cast %67 : vector<8xf32> to vector<8x1xf32>
    %69 = vector.broadcast %68 : vector<8x1xf32> to vector<8x8xf32>
    %70 = arith.subf %66, %69 : vector<8x8xf32>
    %71 = math.exp %70 : vector<8x8xf32>
    %cst_31 = arith.constant dense<0.000000e+00> : vector<8xf32>
    %72 = vector.multi_reduction <add>, %71, %cst_31 [1] : vector<8x8xf32> to vector<8xf32>
    %73 = vector.shape_cast %72 : vector<8xf32> to vector<8x1xf32>
    %74 = arith.truncf %71 : vector<8x8xf32> to vector<8x8xbf16>
    %cst_32 = arith.constant dense<0.000000e+00> : vector<8x8xf32>
    %75 = tpu.matmul %74, %64, %cst_32 {dimension_numbers = #tpu.dot_dimension_numbers<[1], [0], [0], [1], [0, 0, 1, 1], [], []>} : vector<8x8xbf16>, vector<8x8xbf16>, vector<8x8xf32> -> vector<8x8xf32>
    %76 = tpu.reciprocal %73 {approx = true} : vector<8x1xf32> -> vector<8x1xf32>
    %77 = vector.broadcast %76 : vector<8x1xf32> to vector<8x8xf32>
    %78 = arith.mulf %75, %77 : vector<8x8xf32>
    %79 = arith.truncf %78 : vector<8x8xf32> to vector<8x8xbf16>
    %c0_33 = arith.constant 0 : index
    %c16 = arith.constant 16 : index
    %80 = vector.load %arg11[%c0_33, %c16] : memref<8x32xbf16, #tpu.memory_space<vmem>>, vector<8x8xbf16>
    tpu.vector_store %arg11[%c0_33, %c16], %79 {strides = array<i32>} : memref<8x32xbf16, #tpu.memory_space<vmem>>, vector<8x8xbf16>,
    %81 = vector.extract_strided_slice %8 {offsets = [0, 24], sizes = [8, 8], strides = [1, 1]} : vector<8x32xbf16> to vector<8x8xbf16>
    %82 = vector.extract_strided_slice %11 {offsets = [0, 24], sizes = [8, 8], strides = [1, 1]} : vector<8x32xbf16> to vector<8x8xbf16>
    %83 = vector.extract_strided_slice %14 {offsets = [0, 24], sizes = [8, 8], strides = [1, 1]} : vector<8x32xbf16> to vector<8x8xbf16>
    %cst_34 = arith.constant dense<0.000000e+00> : vector<8x8xf32>
    %84 = tpu.matmul %81, %82, %cst_34 {dimension_numbers = #tpu.dot_dimension_numbers<[1], [1], [0], [0], [0, 0, 1, 0], [], []>} : vector<8x8xbf16>, vector<8x8xbf16>, vector<8x8xf32> -> vector<8x8xf32>
    %85 = arith.addf %84, %23 : vector<8x8xf32>
    %cst_35 = arith.constant dense<0xFF800000> : vector<8xf32>
    %86 = vector.multi_reduction <maximumf>, %85, %cst_35 [1] : vector<8x8xf32> to vector<8xf32>
    %87 = vector.shape_cast %86 : vector<8xf32> to vector<8x1xf32>
    %88 = vector.broadcast %87 : vector<8x1xf32> to vector<8x8xf32>
    %89 = arith.subf %85, %88 : vector<8x8xf32>
    %90 = math.exp %89 : vector<8x8xf32>
    %cst_36 = arith.constant dense<0.000000e+00> : vector<8xf32>
    %91 = vector.multi_reduction <add>, %90, %cst_36 [1] : vector<8x8xf32> to vector<8xf32>
    %92 = vector.shape_cast %91 : vector<8xf32> to vector<8x1xf32>
    %93 = arith.truncf %90 : vector<8x8xf32> to vector<8x8xbf16>
    %cst_37 = arith.constant dense<0.000000e+00> : vector<8x8xf32>
    %94 = tpu.matmul %93, %83, %cst_37 {dimension_numbers = #tpu.dot_dimension_numbers<[1], [0], [0], [1], [0, 0, 1, 1], [], []>} : vector<8x8xbf16>, vector<8x8xbf16>, vector<8x8xf32> -> vector<8x8xf32>
    %95 = tpu.reciprocal %92 {approx = true} : vector<8x1xf32> -> vector<8x1xf32>
    %96 = vector.broadcast %95 : vector<8x1xf32> to vector<8x8xf32>
    %97 = arith.mulf %94, %96 : vector<8x8xf32>
    %98 = arith.truncf %97 : vector<8x8xf32> to vector<8x8xbf16>
    %c0_38 = arith.constant 0 : index
    %c24 = arith.constant 24 : index
    %99 = vector.load %arg11[%c0_38, %c24] : memref<8x32xbf16, #tpu.memory_space<vmem>>, vector<8x8xbf16>
    tpu.vector_store %arg11[%c0_38, %c24], %98 {strides = array<i32>} : memref<8x32xbf16, #tpu.memory_space<vmem>>, vector<8x8xbf16>,
    %c0_39 = arith.constant 0 : index
    %c0_40 = arith.constant 0 : index
    %100 = vector.load %arg11[%c0_39, %c0_40] : memref<8x32xbf16, #tpu.memory_space<vmem>>, vector<8x32xbf16>
    %c0_41 = arith.constant 0 : index
    %c0_42 = arith.constant 0 : index
    %101 = vector.load %arg8[%c0_41, %c0_42] : memref<32x32xbf16, #tpu.memory_space<vmem>>, vector<32x32xbf16>
    %cst_43 = arith.constant dense<0.000000e+00> : vector<8x32xf32>
    %102 = tpu.matmul %100, %101, %cst_43 {dimension_numbers = #tpu.dot_dimension_numbers<[1], [0], [0], [1], [0, 0, 1, 1], [], []>} : vector<8x32xbf16>, vector<32x32xbf16>, vector<8x32xf32> -> vector<8x32xf32>
    %c0_44 = arith.constant 0 : index
    %c0_45 = arith.constant 0 : index
    %103 = vector.load %arg9[%c0_44, %c0_45] : memref<1x32xf32, #tpu.memory_space<vmem>>, vector<1x32xf32>
    %104 = vector.broadcast %103 : vector<1x32xf32> to vector<8x32xf32>
    %105 = arith.addf %102, %104 : vector<8x32xf32>
    %c0_46 = arith.constant 0 : index
    %c0_47 = arith.constant 0 : index
    %c0_48 = arith.constant 0 : index
    %106 = vector.load %arg10[%c0_46, %c0_47, %c0_48] : memref<1x8x32xf32, #tpu.memory_space<vmem>>, vector<1x8x32xf32>
    %107 = vector.shape_cast %106 : vector<1x8x32xf32> to vector<8x32xf32>
    %108 = vector.shape_cast %105 : vector<8x32xf32> to vector<1x8x32xf32>
    tpu.vector_store %arg10[%c0_46, %c0_47, %c0_48], %108 {strides = array<i32>} : memref<1x8x32xf32, #tpu.memory_space<vmem>>, vector<1x8x32xf32>,
    return
  }
  func.func @transform_0(%arg0: i32, %arg1: i32) -> (i32, i32, i32) {
    %c0_i32 = arith.constant 0 : i32
    %c0_i32_0 = arith.constant 0 : i32
    return %arg0, %arg1, %c0_i32 : i32, i32, i32
  }
  func.func @transform_1(%arg0: i32, %arg1: i32) -> (i32, i32, i32) {
    %c0_i32 = arith.constant 0 : i32
    %c0_i32_0 = arith.constant 0 : i32
    %c0_i32_1 = arith.constant 0 : i32
    return %arg0, %c0_i32, %c0_i32_0 : i32, i32, i32
  }
  func.func @transform_2(%arg0: i32, %arg1: i32) -> (i32, i32, i32) {
    %c0_i32 = arith.constant 0 : i32
    %c0_i32_0 = arith.constant 0 : i32
    %c0_i32_1 = arith.constant 0 : i32
    return %arg0, %c0_i32, %c0_i32_0 : i32, i32, i32
  }
  func.func @transform_3(%arg0: i32, %arg1: i32) -> (i32, i32) {
    %c0_i32 = arith.constant 0 : i32
    %c0_i32_0 = arith.constant 0 : i32
    %c0_i32_1 = arith.constant 0 : i32
    return %c0_i32, %c0_i32_0 : i32, i32
  }
  func.func @transform_4(%arg0: i32, %arg1: i32) -> (i32, i32) {
    %c0_i32 = arith.constant 0 : i32
    %c0_i32_0 = arith.constant 0 : i32
    %c0_i32_1 = arith.constant 0 : i32
    return %c0_i32, %c0_i32_0 : i32, i32
  }
  func.func @transform_5(%arg0: i32, %arg1: i32) -> (i32, i32) {
    %c0_i32 = arith.constant 0 : i32
    %c0_i32_0 = arith.constant 0 : i32
    %c0_i32_1 = arith.constant 0 : i32
    return %c0_i32, %c0_i32_0 : i32, i32
  }
  func.func @transform_6(%arg0: i32, %arg1: i32) -> (i32, i32) {
    %c0_i32 = arith.constant 0 : i32
    %c0_i32_0 = arith.constant 0 : i32
    %c0_i32_1 = arith.constant 0 : i32
    return %c0_i32, %c0_i32_0 : i32, i32
  }
  func.func @transform_7(%arg0: i32, %arg1: i32) -> (i32, i32) {
    %c0_i32 = arith.constant 0 : i32
    %c0_i32_0 = arith.constant 0 : i32
    %c0_i32_1 = arith.constant 0 : i32
    return %c0_i32, %c0_i32_0 : i32, i32
  }
  func.func @transform_8(%arg0: i32, %arg1: i32) -> (i32, i32, i32) {
    %c0_i32 = arith.constant 0 : i32
    %c0_i32_0 = arith.constant 0 : i32
    return %arg0, %arg1, %c0_i32 : i32, i32, i32
  }
}

</mosaic_0001>

<bundles_post_ra>
// kernel: tpu_custom_call.1
= control target key start
LH: loop header
LB: loop body
LE: loop exit
PB: predicated region body
PF: predicated region fallthrough
CT: control target
= control target key end

     0   :  { %s2412_s0 = inlined_call_operand.hbm [shape: bf16[2,8,32], index: 0, kind: input, shape index: {}]   ;;  %s2413_s1 = inlined_call_operand.hbm [shape: bf16[2,8,32], index: 1, kind: input, shape index: {}]   ;;  %s2414_s2 = inlined_call_operand.hbm [shape: bf16[2,8,32], index: 2, kind: input, shape index: {}]   ;;  %s2415_s3 = inlined_call_operand.hbm [shape: bf16[32,32], index: 3, kind: input, shape index: {}]   ;;  %s2416_s4 = inlined_call_operand.hbm [shape: bf16[32,32], index: 4, kind: input, shape index: {}]   ;;  %s2417_s5 = inlined_call_operand.vmem [shape: bf16[32,32], index: 5, kind: input, shape index: {}]   ;;  %s2418_s6 = inlined_call_operand.hbm [shape: bf16[32,32], index: 6, kind: input, shape index: {}]   ;;  %s2419_s7 = inlined_call_operand.vmem [shape: f32[1,32], index: 7, kind: input, shape index: {}]   ;;  %s2420_s8 = inlined_call_operand.hbm [shape: f32[2,8,32], index: 8, kind: output, shape index: {}]  }
   0x1   :  { %2447 = sst [smem:[#allocation28_spill]] %s2413_s1 }
   0x2   :  { %2448 = sst [smem:[#allocation29_spill]] %s2415_s3 }
   0x3   :  { %2449 = sst [smem:[#allocation30_spill]] %s2419_s7 }
   0x4   :  { %2450 = sst [smem:[#allocation31_spill]] %s2420_s8 }
   0x5   :  { %13 = vsyncpa [#allocation4], 0 }
   0x6   :  { %15 = vsyncpa [#allocation4 + $0x1], 0 }
   0x7   :  { %16 = vsyncpa [#allocation7], 0 }
   0x8   :  { %18 = vsyncpa [#allocation7 + $0x1], 0 }
   0x9   :  { %19 = vsyncpa [#allocation10], 0 }
   0xa   :  { %20 = vsyncpa [#allocation13], 0 }
   0xb   :  { %21 = vsyncpa [#allocation5], 0 }
   0xc   :  { %23 = vsyncpa [#allocation5 + $0x1], 0  ;;  %s1980_s27 = smov 0   ;;  %s1982_s28 = smov 0  }
   0xd   :  { %s1984_s29 = smov 0   ;;  %s1986_s30 = smov 0  }
   0xe   :  { %s1988_s9 = smov 0   ;;  %s1990_s10 = smov 0  }
   0xf LB: > { %2451 = sst [smem:[#allocation20_spill]] %s1896_s27  ;;  %s2011_s11 = sadd.s32 4294967295, %s1916_s10   ;;  %s1916_s10 = sphi %s1990_s10, %s29_s10   ;;  %s1912_s9 = sphi %s1988_s9, %s2496_s9   ;;  %s1908_s30 = sphi %s1986_s30, %s2495_s30   ;;  %s1904_s29 = sphi %s1984_s29, %s2499_s29   ;;  %s1900_s28 = sphi %s1982_s28, %s2498_s28   ;;  %s1896_s27 = sphi %s1980_s27, %s2497_s27  }
  0x10   : > { %2452 = sst [smem:[#allocation21_spill]] %s1908_s30  ;;  %s1352_s12 = sadd.s32 4294967294, %s1916_s10  }
  0x11   : > { %2453 = sst [smem:[#allocation22_spill]] %s1912_s9  ;;  %p63_p0 = scmp.ne.s32.totalorder %s1900_s28, %s1896_s27 }
  0x12   : > { %2454 = sst [smem:[#allocation23_spill]] %s1916_s10  ;;  %p2421_p1 = scmp.eq.s32.totalorder %s2011_s11, 0 }
  0x13   : > { %p252_p3 = scmp.eq.s32.totalorder %s1352_s12, 1  ;;  %p1353_p5 = scmp.ge.s32.totalorder %s1916_s10, 1 }
  0x14   : > { %p2020_p4 = por %p2421_p1, %p63_p0  ;;  %p259_p7 = scmp.lt.s32.totalorder %s1916_s10, 3 }
  0x15   : > { %p2025_p6 = por %p252_p3, %p63_p0  ;;  %s1918_s16 = smov [#allocation9]  }
  0x16   : > { %s2455_s13 = scalar_select %p2020_p4, 1, 0 }
  0x17   : > { %s2456_s14 = scalar_select %p2025_p6, 1, 0 }
  0x18   : > { %p2030_p8 = pnand %p1353_p5, %p259_p7  ;;  %s271_s17 = sshll.u32 %s1918_s16, 4  ;;  %s272_s17 = int_to_ptr.vmem [resolvable:$true] %s271_s17 }
  0x19   : > { %2457 = sst [smem:[#allocation24_spill]] %s2456_s14  ;;  %s41_s19 = sadd.s32 1, %s1912_s9 }
  0x1a   : > { %s2458_s15 = scalar_select %p2030_p8, 1, 0 }
  0x1b   : > { %p1531_p9 = pneg %p2030_p8  ;;  %s2460_s3 = sld [smem:[#allocation29_spill]] }
  0x1d   : > { %p2039_p11 = pnand %p1531_p9, %p2421_p1 }
  0x1f   : > { %s2459_s18 = scalar_select %p2039_p11, 1, 0 }
  0x20   : > { %p2052_p13 = pneg %p2039_p11 }
  0x21   : > { %s1648_s22 = scalar_lea.hbm %s2460_s3, 256 }
  0x22   : > { %p1649_p12 = scmp.ne.s32.totalorder %s2460_s3, %s1648_s22  ;;  %p1655_p5 = scmp.lt.u32.totalorder %s1648_s22, %s2460_s3 }
  0x23   : > { %s2461_s25 = scalar_select %p2052_p13, 1, 0 }
  0x24   : > { %p1651_p0 = pnand %p2052_p13, %p1649_p12 }
  0x26   : > { %p1652_p3 = pneg %p1651_p0 }
  0x28   : > { %p1657_p7 = pnand %p1655_p5, %p1652_p3 }
  0x2a   : > { %1660 = shalt.err (!%p1657_p7)
}
  0x2b   : > { %s1661_s16 = scalar_lea.vmem %s272_s17, 256  ;;  %p1669_p2 = scmp.lt.s32.totalorder %s272_s17, %s272_s17 }
  0x2c   : > { %p1662_p9 = scmp.ne.s32.totalorder %s272_s17, %s1661_s16  ;;  %p1670_p6 = scmp.lt.s32.totalorder %s1661_s16, %s1661_s16 }
  0x2e   : > { %p1664_p10 = pnand %p1662_p9, %p2052_p13  ;;  %p1671_p4 = por %p1670_p6, %p1669_p2 }
  0x30   : > { %p1665_p1 = pneg %p1664_p10 }
  0x32   : > { %p1672_p8 = pnand %p1671_p4, %p1665_p1 }
  0x34   : > { %1675 = shalt.err (!%p1672_p8)
}
  0x35   : > { %s2424_s20 = smov 64   ;;  %s2426_s21 = smov 4  }
  0x36   : > { %1534 = dma.hbm_to_vmem [thread:$0]  (!%p2039_p11), %s2460_s3, 256, %s272_s17, [#allocation10], %s2424_s20, %s2424_s20, %s2426_s21  }
  0x37   : > { %p43_p1 = scmp.ge.s32.totalorder %s41_s19, 2  ;;  %s50_s24 = sadd.s32 1, %s1904_s29 }
  0x38   : > { %p57_p2 = scmp.ne.s32.totalorder %s1904_s29, %s1900_s28  ;;  %p58_p4 = scmp.eq.s32.totalorder %s1916_s10, 0 }
  0x39   : > { %s2501_s19 = smov (%p43_p1, %s41_s19), 0  ;;  %p2463_p8 = scmp.eq.s32.totalorder %s2011_s11, 1 }
  0x3a   : > { %2462 = sst [smem:[#allocation25_spill]] %s2501_s19  ;;  %p59_p6 = por %p58_p4, %p57_p2 }
  0x3b   : > { %p2079_p10 = por %p2463_p8, %p57_p2  ;;  %s45_s12 = ssub.s32 %s1912_s9, %s2501_s19 }
  0x3c   : > { %p1558_p12 = scmp.lt.s32.totalorder %s1916_s10, 2  ;;  %p48_p0 = scmp.eq.s32.totalorder %s45_s12, 0 }
  0x3d   : > { %s2464_s26 = scalar_select %p2079_p10, 1, 0 }
  0x3e   : > { %s2429_s16 = sand.u32 1, %s1904_s29   ;;  %s2092_s22 = sshll.u32 %s1912_s9, 6 }
  0x3f   : > { %2465 = sst [smem:[#allocation26_spill]] %s2464_s26  ;;  %s2089_s17 = sshll.u32 %s2429_s16, 2 }
  0x40   : > { %s2095_s23 = scalar_select %p48_p0, %s1904_s29, %s50_s24  }
  0x41   : > { %p2097_p3 = pnand %p1558_p12, %p59_p6  ;;  %s336_s21 = sand.u32 1, %s1916_s10  }
  0x42   : > { %2466 = sst [smem:[#allocation27_spill]] %s2095_s23  ;;  %s2468_s1 = sld [smem:[#allocation28_spill]] }
  0x43   : > { %s2467_s20 = scalar_select %p2097_p3, 1, 0 }
  0x44   : > { %s340_s16 = scalar_lea.vmem [#allocation6], %s2089_s17  ;;  %s1921_s24 = smov [#allocation11]  }
  0x45   : > { %s347_s9 = sshll.u32 %s340_s16, 4  ;;  %s2111_s23 = sshll.u32 %s1921_s24, 4  ;;  %s2109_s9 = int_to_ptr.vmem [resolvable:$true] %s347_s9  ;;  %s285_s23 = int_to_ptr.vmem [resolvable:$true] %s2111_s23 }
  0x46   : > { %s2113_s14 = scalar_lea.sflag [#allocation7], %s336_s21  ;;  %p2119_p7 = pneg %p2097_p3 }
  0x48   : > { %s2106_s12 = scalar_lea.hbm %s2468_s1, %s2092_s22  ;;  %s1681_s10 = scalar_lea.hbm %s2468_s1, 128 }
  0x49   : > { %s1676_s27 = scalar_lea.hbm %s2106_s12, 64  ;;  %p1682_p2 = scmp.lt.u32.totalorder %s2106_s12, %s2468_s1 }
  0x4a   : > { %p1677_p5 = scmp.ne.s32.totalorder %s2106_s12, %s1676_s27  ;;  %p1683_p4 = scmp.lt.u32.totalorder %s1681_s10, %s1676_s27 }
  0x4b   : > { %s2469_s3 = scalar_select %p2119_p7, 1, 0 }
  0x4c   : > { %p1679_p9 = pnand %p2119_p7, %p1677_p5  ;;  %p1684_p6 = por %p1683_p4, %p1682_p2 }
  0x4d   : > { %p1685_p8 = scmp.lt.u32.totalorder %s1676_s27, %s2106_s12 }
  0x4e   : > { %p1680_p1 = pneg %p1679_p9 }
  0x4f   : > { %p1686_p12 = por %p1685_p8, %p1684_p6 }
  0x51   : > { %p1687_p0 = pnand %p1686_p12, %p1680_p1 }
  0x53   : > { %1690 = shalt.err (!%p1687_p0)
}
  0x54   : > { %s1691_s21 = scalar_lea.vmem %s2109_s9, 64  ;;  %s1922_s19 = smov [#allocation6]  }
  0x55   : > { %p1692_p5 = scmp.ne.s32.totalorder %s2109_s9, %s1691_s21  ;;  %s1696_s16 = sshll.u32 %s1922_s19, 4  ;;  %s1697_s16 = int_to_ptr.vmem [resolvable:$false] %s1696_s16 }
  0x56   : > { %s1698_s8 = scalar_lea.vmem %s1697_s16, 128  ;;  %p1699_p11 = scmp.lt.s32.totalorder %s2109_s9, %s1697_s16 }
  0x57   : > { %p1694_p9 = pnand %p1692_p5, %p2119_p7  ;;  %p1700_p13 = scmp.lt.s32.totalorder %s1698_s8, %s1691_s21 }
  0x59   : > { %p1695_p10 = pneg %p1694_p9  ;;  %p1701_p2 = por %p1700_p13, %p1699_p11 }
  0x5b   : > { %p1702_p4 = pnand %p1701_p2, %p1695_p10 }
  0x5d   : > { %1705 = shalt.err (!%p1702_p4)
}
  0x5e   : > { %1547 = dma.hbm_to_vmem [thread:$0]  (!%p2097_p3), %s2106_s12, 64, %s2109_s9, %s2113_s14  }
  0x5f   : > { %s1706_s24 = scalar_lea.hbm %s2416_s4, 256  ;;  %p2470_p11 = scmp.ne.s32.totalorder %s2461_s25, 0 }
  0x60   : > { %p1707_p1 = scmp.ne.s32.totalorder %s2416_s4, %s1706_s24  ;;  %p1713_p6 = scmp.lt.u32.totalorder %s1706_s24, %s2416_s4 }
  0x62   : > { %p1709_p13 = pnand %p1707_p1, %p2470_p11 }
  0x64   : > { %p1710_p10 = pneg %p1709_p13 }
  0x66   : > { %p1715_p8 = pnand %p1713_p6, %p1710_p10 }
  0x68   : > { %1718 = shalt.err (!%p1715_p8)
}
  0x69   : > { %s1719_s8 = scalar_lea.vmem %s285_s23, 256  ;;  %p1727_p9 = scmp.lt.s32.totalorder %s285_s23, %s285_s23 }
  0x6a   : > { %p1720_p12 = scmp.ne.s32.totalorder %s285_s23, %s1719_s8  ;;  %p1728_p2 = scmp.lt.s32.totalorder %s1719_s8, %s1719_s8 }
  0x6c   : > { %p1722_p0 = pnand %p1720_p12, %p2470_p11  ;;  %p1729_p4 = por %p1728_p2, %p1727_p9 }
  0x6e   : > { %p1723_p5 = pneg %p1722_p0 }
  0x70   : > { %p1730_p3 = pnand %p1729_p4, %p1723_p5 }
  0x72   : > { %1733 = shalt.err (!%p1730_p3)
}
  0x73   : > { %p2471_p1 = scmp.ne.s32.totalorder %s2459_s18, 0  ;;  %s2472_s1 = smov 4  }
  0x74   : > { %s2473_s9 = smov 64   ;;  %s1923_s10 = smov [#allocation12]  }
  0x75   : > { %1537 = dma.hbm_to_vmem [thread:$0]  (!%p2471_p1), %s2416_s4, 256, %s285_s23, [#allocation10], %s2473_s9, %s2473_s9, %s2472_s1  }
  0x76   : > { %s300_s24 = sshll.u32 %s1923_s10, 4  ;;  %s1734_s16 = scalar_lea.hbm %s2418_s6, 256  ;;  %s301_s24 = int_to_ptr.vmem [resolvable:$true] %s300_s24 }
  0x77   : > { %p1735_p3 = scmp.ne.s32.totalorder %s2418_s6, %s1734_s16  ;;  %p1741_p6 = scmp.lt.u32.totalorder %s1734_s16, %s2418_s6 }
  0x79   : > { %p1737_p13 = pnand %p1735_p3, %p2470_p11 }
  0x7b   : > { %p1738_p10 = pneg %p1737_p13 }
  0x7d   : > { %p1743_p8 = pnand %p1741_p6, %p1738_p10 }
  0x7f   : > { %1746 = shalt.err (!%p1743_p8)
}
  0x80   : > { %s1747_s23 = scalar_lea.vmem %s301_s24, 256  ;;  %p1755_p9 = scmp.lt.s32.totalorder %s301_s24, %s301_s24 }
  0x81   : > { %p1748_p12 = scmp.ne.s32.totalorder %s301_s24, %s1747_s23  ;;  %p1756_p2 = scmp.lt.s32.totalorder %s1747_s23, %s1747_s23 }
  0x83   : > { %p1750_p0 = pnand %p1748_p12, %p2470_p11  ;;  %p1757_p4 = por %p1756_p2, %p1755_p9 }
  0x85   : > { %p1751_p5 = pneg %p1750_p0 }
  0x87   : > { %p1758_p7 = pnand %p1757_p4, %p1751_p5 }
  0x89   : > { %1761 = shalt.err (!%p1758_p7)
}
  0x8a   : > { %1540 = dma.hbm_to_vmem [thread:$0]  (!%p2471_p1), %s2418_s6, 256, %s301_s24, [#allocation13], %s2473_s9, %s2473_s9, %s2472_s1  }
  0x8b   : > { %s2190_s12 = scalar_lea.hbm %s2412_s0, %s2092_s22  ;;  %s321_s18 = scalar_lea.vmem [#allocation3], %s2089_s17 }
  0x8c   : > { %s329_s27 = sshll.u32 %s321_s18, 4  ;;  %s2474_s10 = sand.u32 1, %s1904_s29   ;;  %s330_s27 = int_to_ptr.vmem [resolvable:$true] %s329_s27 }
  0x8d   : > { %s318_s19 = scalar_lea.sflag [#allocation4], %s2474_s10  ;;  %s1762_s21 = scalar_lea.hbm %s2190_s12, 64 }
  0x8e   : > { %p1763_p7 = scmp.ne.s32.totalorder %s2190_s12, %s1762_s21  ;;  %p2475_p11 = scmp.ne.s32.totalorder %s2469_s3, 0 }
  0x8f   : > { %s1767_s24 = scalar_lea.hbm %s2412_s0, 128  ;;  %p1768_p1 = scmp.lt.u32.totalorder %s2190_s12, %s2412_s0 }
  0x90   : > { %p1765_p3 = pnand %p1763_p7, %p2475_p11  ;;  %p1769_p10 = scmp.lt.u32.totalorder %s1767_s24, %s1762_s21 }
  0x91   : > { %p1771_p8 = scmp.lt.u32.totalorder %s1762_s21, %s2190_s12 }
  0x92   : > { %p1766_p13 = pneg %p1765_p3  ;;  %p1770_p6 = por %p1769_p10, %p1768_p1 }
  0x94   : > { %p1772_p12 = por %p1771_p8, %p1770_p6 }
  0x96   : > { %p1773_p0 = pnand %p1772_p12, %p1766_p13 }
  0x98   : > { %1776 = shalt.err (!%p1773_p0)
}
  0x99   : > { %s1777_s23 = scalar_lea.vmem %s330_s27, 64  ;;  %s1924_s7 = smov [#allocation3]  }
  0x9a   : > { %p1778_p5 = scmp.ne.s32.totalorder %s330_s27, %s1777_s23  ;;  %s1782_s30 = sshll.u32 %s1924_s7, 4  ;;  %s1783_s30 = int_to_ptr.vmem [resolvable:$false] %s1782_s30 }
  0x9b   : > { %s1784_s25 = scalar_lea.vmem %s1783_s30, 128  ;;  %p1785_p4 = scmp.lt.s32.totalorder %s330_s27, %s1783_s30 }
  0x9c   : > { %p1780_p9 = pnand %p1778_p5, %p2475_p11  ;;  %p1786_p7 = scmp.lt.s32.totalorder %s1784_s25, %s1777_s23 }
  0x9e   : > { %p1781_p2 = pneg %p1780_p9  ;;  %p1787_p3 = por %p1786_p7, %p1785_p4 }
  0xa0   : > { %p1788_p1 = pnand %p1787_p3, %p1781_p2 }
  0xa2   : > { %1791 = shalt.err (!%p1788_p1)
}
  0xa3   : > { %p2476_p10 = scmp.ne.s32.totalorder %s2467_s20, 0  ;;  %s2216_s10 = scalar_lea.hbm %s2414_s2, %s2092_s22 }
  0xa4   : > { %s358_s21 = scalar_lea.vmem [#allocation8], %s2089_s17  ;;  %s1792_s9 = scalar_lea.hbm %s2216_s10, 64 }
  0xa5   : > { %1544 = dma.hbm_to_vmem [thread:$0]  (!%p2476_p10), %s2190_s12, 64, %s330_s27, %s318_s19  }
  0xa6   : > { %s365_s1 = sshll.u32 %s358_s21, 4  ;;  %p1793_p13 = scmp.ne.s32.totalorder %s2216_s10, %s1792_s9  ;;  %s366_s1 = int_to_ptr.vmem [resolvable:$true] %s365_s1 }
  0xa7   : > { %s1797_s12 = scalar_lea.hbm %s2414_s2, 128  ;;  %p1798_p12 = scmp.lt.u32.totalorder %s2216_s10, %s2414_s2 }
  0xa8   : > { %p1795_p6 = pnand %p1793_p13, %p2475_p11  ;;  %p1799_p0 = scmp.lt.u32.totalorder %s1797_s12, %s1792_s9 }
  0xa9   : > { %p1801_p9 = scmp.lt.u32.totalorder %s1792_s9, %s2216_s10 }
  0xaa   : > { %p1796_p8 = pneg %p1795_p6  ;;  %p1800_p5 = por %p1799_p0, %p1798_p12 }
  0xac   : > { %p1802_p2 = por %p1801_p9, %p1800_p5 }
  0xae   : > { %p1803_p4 = pnand %p1802_p2, %p1796_p8 }
  0xb0   : > { %1806 = shalt.err (!%p1803_p4)
}
  0xb1   : > { %s1807_s17 = scalar_lea.vmem %s366_s1, 64  ;;  %s1925_s22 = smov [#allocation8]  }
  0xb2   : > { %p1808_p7 = scmp.ne.s32.totalorder %s366_s1, %s1807_s17  ;;  %s1812_s8 = sshll.u32 %s1925_s22, 4  ;;  %s1813_s8 = int_to_ptr.vmem [resolvable:$false] %s1812_s8 }
  0xb3   : > { %s1814_s23 = scalar_lea.vmem %s1813_s8, 128  ;;  %p1815_p13 = scmp.lt.s32.totalorder %s366_s1, %s1813_s8 }
  0xb4   : > { %p1810_p3 = pnand %p1808_p7, %p2475_p11  ;;  %p1816_p6 = scmp.lt.s32.totalorder %s1814_s23, %s1807_s17 }
  0xb6   : > { %p1811_p1 = pneg %p1810_p3  ;;  %p1817_p10 = por %p1816_p6, %p1815_p13 }
  0xb8   : > { %p1818_p0 = pnand %p1817_p10, %p1811_p1 }
  0xba   : > { %1821 = shalt.err (!%p1818_p0)
}
  0xbb   : > { %p2477_p12 = scmp.ne.s32.totalorder %s2467_s20, 0  ;;  %p2478_p8 = scmp.ne.s32.totalorder %s2458_s15, 0 }
  0xbc   : > { %s2240_s3 = sand.u32 (!%p2478_p8), 1, %s1900_s28   ;;  %p2479_p11 = scmp.ne.s32.totalorder (!%p2478_p8), %s2455_s13, 0 }
  0xbd   : > { %1550 = dma.hbm_to_vmem [thread:$0]  (!%p2477_p12), %s2216_s10, 64, %s366_s1, %s2113_s14  }
  0xbe   : > { %374 = sbr.rel (%p2478_p8) target bundleno = 1512 (0x5e8), region = 52  ;;  %s2243_s7 = sshll.u32 (!%p2478_p8), %s2240_s3, 2 }
  0xbf   : > { %s377_s30 = scalar_lea.sflag (!%p2478_p8), [#allocation4], %s2240_s3  ;;  %s380_s25 = scalar_lea.vmem (!%p2478_p8), [#allocation3], %s2243_s7 }
  0xc5   : > { %1875 = dma.done.wait (%p2479_p11), %s377_s30, 64  }
  0xc6   : > { %1877 = vsyncadd (%p2479_p11), %s377_s30, 4294967232  ;;  %s385_s14 = sand.u32 1, %s2011_s11   ;;  %s389_s20 = scalar_lea.vmem [#allocation6], %s2243_s7 }
  0xc7   : > { %s386_s15 = scalar_lea.sflag [#allocation7], %s385_s14 }
  0xc8   : > { %1879 = dma.done.wait (%p2479_p11), %s386_s15, 128  }
  0xc9   : > { %1881 = vsyncadd (%p2479_p11), %s386_s15, 4294967168  ;;  %s398_s26 = scalar_lea.vmem [#allocation8], %s2243_s7  ;;  %p2480_p10 = scmp.eq.s32.totalorder %s2011_s11, 0 }
  0xcb   : > { %1883 = dma.done.wait (%p2480_p10), [#allocation10], 512   ;;  %p2481_p5 = pmov %p2480_p10 }
  0xcd   : > { %1885 = vsyncadd (%p2481_p5), [#allocation10], 4294966784  ;;  %p2482_p9 = pmov %p2481_p5 }
  0xce   : > { %p2483_p2 = pmov %p2481_p5 }
  0xcf   : > { %1887 = dma.done.wait (%p2482_p9), [#allocation13], 256  }
  0xd0   : > { %1889 = vsyncadd (%p2483_p2), [#allocation13], 4294967040  ;;  %v1926_v0 = vmov 0.0   ;;  %vm1927_vm0 = vmmov 0   ;;  %v1624_v1 = vld [vmem:[#allocation11] sm:$0xff]   ;;  %v1625_v2 = vld [vmem:[#allocation9] sm:$0xff]   ;;  %v639_v30 = vlaneseq }
  0xd1   : > { %1439 = vmatprep.subr.bf16.mxu1 %v1926_v0  ;;  %1431 = vmatprep.subr.bf16.mxu0 %v1926_v0  ;;  %v1626_v3 = vld [vmem:[#allocation11 + $0x8] sm:$0xff]   ;;  %v455_v4 = vld [vmem:[%s389_s20] sm:$0xf]  ;;  %vm473_vm1 = vcmask 261120   ;;  %v1627_v5 = vld [vmem:[#allocation9 + $0x8] sm:$0xff]   ;;  %vm647_vm2 = vcmask 64512  }
  0xd2   : > { %1443 = vmatprep.mubr.msk.bf16.mxu1 %vm1927_vm0, %v1926_v0  ;;  %1435 = vmatprep.mubr.msk.bf16.mxu0 %vm1927_vm0, %v1926_v0  ;;  %v454_v6 = vld [vmem:[%s380_s25] sm:$0xf]  ;;  %s1928_s11 = smov 112   ;;  %s1929_s13 = smov 120   ;;  %v1628_v18 = vld [vmem:[%s2417_s5] sm:$0xff]   ;;  %v1629_v19 = vld [vmem:[%s2417_s5 + $0x8] sm:$0xff]  }
  0xd3   : > { %1440 = vmatpush3.bf16.msra.mxu1 %v1624_v1  ;;  %1432 = vmatpush3.bf16.msra.mxu0 %v1625_v2  ;;  %s1930_s18 = smov 104   ;;  %v456_v20 = vld [vmem:[%s398_s26] sm:$0xf]  ;;  %v640_v31 = vshrl.u32 %v639_v30, 7  ;;  %v644_v32 = vand.u32 127, %v639_v30  ;;  %vm707_vm4 = vcmask 1043456  }
  0xd4   : > { %1441 = vmatprep.subr.bf16.mxu1 %v1926_v0  ;;  %1433 = vmatprep.subr.bf16.mxu0 %v1926_v0  ;;  %vm754_vm5 = vcmask 60416   ;;  %s1931_s24 = smov 8   ;;  %s1932_s16 = smov 16   ;;  %vm876_vm6 = vcmask 126016   ;;  %vm995_vm7 = vcmask 191616   ;;  %vm1114_vm8 = vcmask 257216  }
  0xd5   : > { %vm645_vm3 = vcmp.gt.s32.totalorder %v644_v32, %v640_v31  ;;  %s2484_s12 = sld [smem:[#allocation21_spill]]  ;;  %s1933_s27 = smov 24  }
  0xd6   : > { %v646_v33 = vsel %vm645_vm3, -1e+13, %v1926_v0  ;;  %s1371_s19 = sshll.u32 %s2240_s3, 3  ;;  %s2485_s8 = sld [smem:[#allocation30_spill]] }
  0xd7   : > { %1442 = vmatpush3.bf16.msra.mxu1 %v1626_v3  ;;  %1434 = vmatpush3.bf16.msra.mxu0 %v1627_v5  ;;  %s2486_s23 = sld [smem:[#allocation26_spill]]  ;;  %s452_s30 = scalar_lea.vmem [#allocation14], %s1371_s19 }
  0xd8   : > { %1455 = vmatprep.subr.bf16.mxu1 %v1926_v0  ;;  %1447 = vmatprep.subr.bf16.mxu0 %v1926_v0  ;;  %s1199_s25 = sshll.u32 %s452_s30, 4  ;;  %s2487_s20 = sld [smem:[#allocation31_spill]]  ;;  %s2364_s25 = int_to_ptr.vmem [resolvable:$true] %s1199_s25 }
  0xda   : > { %1444 = vmatmul.mubr.msk.bf16.vlgmr.msra.gmra.mrb[0].mxu1 %vm473_vm1, %v455_v4  ;;  %1436 = vmatmul.mubr.msk.bf16.vlgmr.msra.gmra.mrb[0].mxu0 %vm473_vm1, %v454_v6 }
  0xdb   : > { %1457 = vmatprep.mubr.msk.bf16.mxu1 %vm1927_vm0, %v1926_v0  ;;  %1451 = vmatprep.mubr.msk.bf16.mxu0 %vm1927_vm0, %v1926_v0  ;;  %s1397_s7 = sshll.u32 %s2484_s12, 7 }
  0xdc   : > { %1448 = vmatpush3.bf16.msra.mxu0 %v1628_v18 }
  0xdd   : > { %1449 = vmatprep.subr.bf16.mxu0 %v1926_v0  ;;  %p2488_p7 = scmp.ne.s32.totalorder %s2486_s23, 0 }
  0xde   : > { %s2362_s26 = scalar_lea.hbm %s2487_s20, %s1397_s7 }
  0xe0   : > { %1450 = vmatpush3.bf16.msra.mxu0 %v1629_v19 }
  0xe1   : > { %1461 = vmatprep.subr.bf16.mxu0 %v1926_v0 }
  0xe3   : > { %1452 = vmatmul.mubr.msk.bf16.vlgmr.msra.gmra.mrb[4].mxu0 %vm473_vm1, %v456_v20 }
  0xe4   : > { %1463 = vmatprep.mubr.msk.bf16.mxu0 %vm1927_vm0, %v1926_v0 }
 0x1ad   : > { %v571_v7 = vpop.f32.mrb[0].mxu1  ;;  %v511_v10 = vpop.f32.mrb[0].mxu0 }
 0x1ae   : > { %v577_v8 = vpack.c.bf16 %v571_v7, %v571_v7  ;;  %v1445_v9 = vpop.f32.mrb[1].mxu1  ;;  %v1437_v12 = vpop.f32.mrb[1].mxu0  ;;  %v517_v14 = vpack.c.bf16 %v511_v10, %v511_v10 }
 0x1af   : > { %v574_v11 = vpop.f32.mrb[2].mxu1  ;;  %v514_v16 = vpop.f32.mrb[2].mxu0 }
 0x1b0   : > { %880 = vrot.lane.b32.xlu1 %v577_v8, %s1928_s11  ;;  %760 = vrot.lane.b32.xlu0 %v577_v8, %s1929_s13  ;;  %v1446_v13 = vpop.f32.mrb[3].mxu1  ;;  %v652_v15 = vsel %vm647_vm2, %v577_v8, 0  ;;  %v1438_v17 = vpop.f32.mrb[3].mxu0 }
 0x1b1   : > { %1456 = vmatpush3.bf16.xpose.msra.mxu1 %v652_v15 }
 0x1b2   : > { %1467 = vmatprep.subr.bf16.mxu1 %v1926_v0 }
 0x1b4   : > { %878 = vrot.lane.b32.xlu1 %v517_v14, %s1928_s11  ;;  %757 = vrot.lane.b32.xlu0 %v517_v14, %s1929_s13 }
 0x1b6   : > { %v631_v40 = vpop.f32.mrb[4].mxu0 }
 0x1b7   : > { %v1453_v41 = vpop.f32.mrb[5].mxu0  ;;  %v637_v44 = vpack.c.bf16 %v631_v40, %v631_v40 }
 0x1b8   : > { %997 = vrot.lane.b32.xlu1 %v517_v14, %s1930_s18  ;;  %999 = vrot.lane.b32.xlu0 %v577_v8, %s1930_s18  ;;  %v634_v42 = vpop.f32.mrb[6].mxu0 }
 0x1b9   : > { %1458 = vmatmul.mubr.msk.bf16.vlgmr.msra.gmra.mrb[4].mxu1 %vm647_vm2, %v517_v14  ;;  %v1454_v43 = vpop.f32.mrb[7].mxu0  ;;  %v709_v45 = vsel %vm707_vm4, %v637_v44, 0 }
 0x1ba   : > { %1469 = vmatprep.mubr.msk.bf16.mxu1 %vm1927_vm0, %v1926_v0  ;;  %1462 = vmatpush3.bf16.msra.mxu0 %v709_v45 }
 0x1bb   : > { %1473 = vmatprep.subr.bf16.mxu0 %v1926_v0 }
 0x222   : > { %v761_v21 = vpop.permute.xlu0 %760  ;;  %v881_v23 = vpop.permute.xlu1 %880 }
 0x223   : > { %v766_v22 = vsel %vm647_vm2, %v761_v21, 0  ;;  %v886_v25 = vsel %vm647_vm2, %v881_v23, 0 }
 0x224   : > { %1468 = vmatpush3.bf16.xpose.msra.mxu1 %v766_v22 }
 0x225   : > { %1479 = vmatprep.subr.bf16.mxu1 %v1926_v0 }
 0x226   : > { %v758_v24 = vpop.permute.xlu0 %757  ;;  %v879_v27 = vpop.permute.xlu1 %878 }
 0x22a   : > { %v1000_v26 = vpop.permute.xlu0 %999  ;;  %v998_v29 = vpop.permute.xlu1 %997 }
 0x22b   : > { %1470 = vmatmul.mubr.msk.bf16.vlgmr.msra.gmra.mrb[8].mxu1 %vm647_vm2, %v758_v24  ;;  %v1005_v28 = vsel %vm647_vm2, %v1000_v26, 0 }
 0x22c   : > { %1480 = vmatpush3.bf16.xpose.msra.mxu1 %v886_v25  ;;  %1481 = vmatprep.mubr.msk.bf16.mxu1 %vm1927_vm0, %v1926_v0 }
 0x22d   : > { %1491 = vmatprep.subr.bf16.mxu1 %v1926_v0 }
 0x233   : > { %1482 = vmatmul.mubr.msk.bf16.vlgmr.msra.gmra.mrb[12].mxu1 %vm647_vm2, %v879_v27 }
 0x234   : > { %1492 = vmatpush3.bf16.xpose.msra.mxu1 %v1005_v28  ;;  %1493 = vmatprep.mubr.msk.bf16.mxu1 %vm1927_vm0, %v1926_v0 }
 0x235   : > { %1503 = vmatprep.subr.bf16.mxu1 %v1926_v0 }
 0x23b   : > { %1494 = vmatmul.mubr.msk.bf16.vlgmr.msra.gmra.mrb[16].mxu1 %vm647_vm2, %v998_v29 }
 0x23c   : > { %1507 = vmatprep.mubr.msk.bf16.mxu1 %vm1927_vm0, %v1926_v0 }
 0x28c   : > { %v688_v34 = vpop.f32.mrb[4].mxu1 }
 0x28d   : > { %v689_v35 = vadd.f32 %v688_v34, %v646_v33  ;;  %v1459_v36 = vpop.f32.mrb[5].mxu1 }
 0x28e   : > { %v691_v37 = vpop.f32.mrb[6].mxu1 }
 0x28f   : > { %v1460_v38 = vpop.f32.mrb[7].mxu1  ;;  %v694_v39 = vsel %vm647_vm2, %v689_v35, -inf }
 0x290   : > { %695 = vmax.xlane.f32.xlu0 %v694_v39 }
 0x2fe   : > { %v802_v46 = vpop.f32.mrb[8].mxu1 }
 0x2ff   : > { %v803_v47 = vadd.f32 %v802_v46, %v646_v33  ;;  %v1471_v48 = vpop.f32.mrb[9].mxu1 }
 0x300   : > { %v805_v49 = vpop.f32.mrb[10].mxu1 }
 0x301   : > { %v1472_v50 = vpop.f32.mrb[11].mxu1  ;;  %v808_v51 = vsel %vm647_vm2, %v803_v47, -inf }
 0x302   : > { %809 = vmax.xlane.f32.xlu1 %v808_v51  ;;  %v1630_v51 = vld [vmem:[#allocation12] sm:$0xff]  }
 0x303   : > { %1504 = vmatpush3.bf16.msra.mxu1 %v1630_v51 }
 0x304   : > { %1505 = vmatprep.subr.bf16.mxu1 %v1926_v0 }
 0x306   : > { %v922_v52 = vpop.f32.mrb[12].mxu1 }
 0x307   : > { %v923_v53 = vadd.f32 %v922_v52, %v646_v33  ;;  %v1483_v54 = vpop.f32.mrb[13].mxu1 }
 0x308   : > { %v925_v55 = vpop.f32.mrb[14].mxu1 }
 0x309   : > { %v1484_v56 = vpop.f32.mrb[15].mxu1  ;;  %v928_v57 = vsel %vm647_vm2, %v923_v53, -inf  ;;  %v1631_v55 = vld [vmem:[#allocation12 + $0x8] sm:$0xff]  }
 0x30a   : > { %929 = vmax.xlane.f32.xlu0 %v928_v57  ;;  %1506 = vmatpush3.bf16.msra.mxu1 %v1631_v55 }
 0x30e   : > { %v1041_v58 = vpop.f32.mrb[16].mxu1 }
 0x30f   : > { %v1042_v59 = vadd.f32 %v1041_v58, %v646_v33  ;;  %v1495_v60 = vpop.f32.mrb[17].mxu1 }
 0x310   : > { %v1044_v61 = vpop.f32.mrb[18].mxu1 }
 0x311   : > { %v1496_v62 = vpop.f32.mrb[19].mxu1  ;;  %v1047_v63 = vsel %vm647_vm2, %v1042_v59, -inf }
 0x312   : > { %1048 = vmax.xlane.f32.xlu0 %v1047_v63 }
 0x313   : > { %819 = vrot.lane.b32.xlu1 %v637_v44, %s1929_s13  ;;  %s1822_s13 = scalar_lea.vmem %s2364_s25, 128 }
 0x314   : > { %p1823_p4 = scmp.ne.s32.totalorder %s2364_s25, %s1822_s13 }
 0x316   : > { %p1824_p3 = pnand %p1823_p4, %p2488_p7 }
 0x317   : > { %1057 = vrot.lane.b32.xlu1 %v637_v44, %s1930_s18  ;;  %s1934_s18 = smov [#allocation14]  }
 0x318   : > { %p1825_p1 = pneg %p1824_p3  ;;  %s1826_s10 = sshll.u32 %s1934_s18, 4  ;;  %s1827_s10 = int_to_ptr.vmem [resolvable:$false] %s1826_s10 }
 0x319   : > { %s1828_s21 = scalar_lea.vmem %s1827_s10, 256  ;;  %p1829_p13 = scmp.lt.s32.totalorder %s2364_s25, %s1827_s10 }
 0x31a   : > { %p1830_p6 = scmp.lt.s32.totalorder %s1828_s21, %s1822_s13 }
 0x31c   : > { %p1831_p0 = por %p1830_p6, %p1829_p13 }
 0x31d   : > { %v696_v1 = vpop.xlane.xlu0 %695 }
 0x31e   : > { %v697_v2 = vsub.f32 %v689_v35, %v696_v1  ;;  %p1832_p12 = pnand %p1831_p0, %p1825_p1 }
 0x320   : > { %v698_v3 = vmul.f32 1.442695, %v697_v2 }
 0x322   : > { %1632 = vpow2.f32 %v698_v3 }
 0x328   : > { %938 = vrot.lane.b32.xlu0 %v637_v44, %s1928_s11  ;;  %s1185_s11 = scalar_lea.sflag [#allocation5], %s2240_s3 }
 0x32c   : > { %v1633_v4 = vpop.eup %1632 }
 0x32d   : > { %v703_v5 = vpack.c.bf16 %v1633_v4, %v1633_v4  ;;  %v700_v21 = vsel %vm647_vm2, %v1633_v4, 0.0 }
 0x32f   : > { %1464 = vmatmul.mubr.msk.bf16.vlgmr.msra.gmra.mrb[8].mxu0 %vm647_vm2, %v703_v5  ;;  %v1392_v5 = vld [vmem:[%s2485_s8] ss:$0 sm:$0xff] }
 0x330   : > { %1475 = vmatprep.mubr.msk.bf16.mxu0 %vm1927_vm0, %v1926_v0 }
 0x38f   : > { %v810_v6 = vpop.xlane.xlu1 %809 }
 0x390   : > { %v811_v7 = vsub.f32 %v803_v47, %v810_v6 }
 0x392   : > { %v812_v8 = vmul.f32 1.442695, %v811_v7 }
 0x393   : > { %v820_v9 = vpop.permute.xlu1 %819 }
 0x394   : > { %1634 = vpow2.f32 %v812_v8  ;;  %v825_v10 = vsel %vm707_vm4, %v820_v9, 0 }
 0x395   : > { %1474 = vmatpush3.bf16.msra.mxu0 %v825_v10 }
 0x396   : > { %1485 = vmatprep.subr.bf16.mxu0 %v1926_v0 }
 0x397   : > { %v930_v11 = vpop.xlane.xlu0 %929  ;;  %v1058_v24 = vpop.permute.xlu1 %1057 }
 0x398   : > { %v931_v12 = vsub.f32 %v923_v53, %v930_v11  ;;  %v1063_v27 = vsel %vm707_vm4, %v1058_v24, 0 }
 0x39a   : > { %v932_v13 = vmul.f32 1.442695, %v931_v12 }
 0x39c   : > { %1636 = vpow2.f32 %v932_v13 }
 0x39e   : > { %v1635_v14 = vpop.eup %1634 }
 0x39f   : > { %v1049_v15 = vpop.xlane.xlu0 %1048  ;;  %v814_v16 = vsel %vm647_vm2, %v1635_v14, 0.0  ;;  %v817_v17 = vpack.c.bf16 %v1635_v14, %v1635_v14 }
 0x3a0   : > { %v1050_v18 = vsub.f32 %v1042_v59, %v1049_v15  ;;  %815 = vadd.xlane.f32.xlu1 %v814_v16 }
 0x3a1   : > { %1476 = vmatmul.mubr.msk.bf16.vlgmr.msra.gmra.mrb[12].mxu0 %vm647_vm2, %v817_v17 }
 0x3a2   : > { %v1051_v19 = vmul.f32 1.442695, %v1050_v18  ;;  %1487 = vmatprep.mubr.msk.bf16.mxu0 %vm1927_vm0, %v1926_v0 }
 0x3a3   : > { %v939_v20 = vpop.permute.xlu0 %938 }
 0x3a4   : > { %1638 = vpow2.f32 %v1051_v19  ;;  %v944_v22 = vsel %vm707_vm4, %v939_v20, 0  ;;  %701 = vadd.xlane.f32.xlu1 %v700_v21 }
 0x3a5   : > { %1486 = vmatpush3.bf16.msra.mxu0 %v944_v22 }
 0x3a6   : > { %v1637_v23 = vpop.eup %1636  ;;  %1497 = vmatprep.subr.bf16.mxu0 %v1926_v0 }
 0x3a7   : > { %v934_v25 = vsel %vm647_vm2, %v1637_v23, 0.0  ;;  %v937_v26 = vpack.c.bf16 %v1637_v23, %v1637_v23 }
 0x3a8   : > { %935 = vadd.xlane.f32.xlu0 %v934_v25 }
 0x3a9   : > { %1488 = vmatmul.mubr.msk.bf16.vlgmr.msra.gmra.mrb[16].mxu0 %vm647_vm2, %v937_v26 }
 0x3aa   : > { %1498 = vmatpush3.bf16.msra.mxu0 %v1063_v27  ;;  %1499 = vmatprep.mubr.msk.bf16.mxu0 %vm1927_vm0, %v1926_v0 }
 0x3ae   : > { %v1639_v28 = vpop.eup %1638 }
 0x3af   : > { %v1053_v29 = vsel %vm647_vm2, %v1639_v28, 0.0  ;;  %v1056_v30 = vpack.c.bf16 %v1639_v28, %v1639_v28 }
 0x3b0   : > { %1054 = vadd.xlane.f32.xlu0 %v1053_v29 }
 0x3b1   : > { %1500 = vmatmul.mubr.msk.bf16.vlgmr.msra.gmra.mrb[20].mxu0 %vm647_vm2, %v1056_v30 }
 0x402   : > { %v745_v31 = vpop.f32.mrb[8].mxu0 }
 0x403   : > { %v1465_v32 = vpop.f32.mrb[9].mxu0 }
 0x404   : > { %v748_v33 = vpop.f32.mrb[10].mxu0 }
 0x405   : > { %v1466_v34 = vpop.f32.mrb[11].mxu0 }
 0x42d   : > { %v816_v35 = vpop.xlane.xlu1 %815 }
 0x431   : > { %v702_v36 = vpop.xlane.xlu1 %701 }
 0x432   : > { %1640 = vrcp.f32 %v702_v36 }
 0x433   : > { %1642 = vrcp.f32 %v816_v35 }
 0x435   : > { %v936_v40 = vpop.xlane.xlu0 %935 }
 0x436   : > { %1644 = vrcp.f32 %v936_v40 }
 0x43c   : > { %v1641_v37 = vpop.eup %1640 }
 0x43d   : > { %v752_v38 = vmul.f32 %v1641_v37, %v745_v31  ;;  %v1643_v41 = vpop.eup %1642  ;;  %v1055_v46 = vpop.xlane.xlu0 %1054 }
 0x43e   : > { %1646 = vrcp.f32 %v1055_v46 }
 0x43f   : > { %v753_v39 = vpack.c.bf16 %v752_v38, %v752_v38 }
 0x440   : > { %v1645_v49 = vpop.eup %1644 }
 0x441   : > { %755 = vst.msk [vmem:[#allocation2] sm:$0xf] %vm754_vm5, %v753_v39 }
 0x448   : > { %v1647_v58 = vpop.eup %1646 }
 0x474   : > { %v861_v42 = vpop.f32.mrb[12].mxu0 }
 0x475   : > { %v868_v43 = vmul.f32 %v1643_v41, %v861_v42  ;;  %v1477_v44 = vpop.f32.mrb[13].mxu0 }
 0x476   : > { %v864_v45 = vpop.f32.mrb[14].mxu0 }
 0x477   : > { %v1400_v47 = vpack.c.bf16 %v868_v43, %v868_v43  ;;  %v1478_v48 = vpop.f32.mrb[15].mxu0 }
 0x479   : > { %873 = vrot.lane.b32.xlu0 %v1400_v47, %s1931_s24 }
 0x47c   : > { %v980_v50 = vpop.f32.mrb[16].mxu0 }
 0x47d   : > { %v987_v52 = vmul.f32 %v1645_v49, %v980_v50  ;;  %v1489_v53 = vpop.f32.mrb[17].mxu0 }
 0x47e   : > { %v983_v54 = vpop.f32.mrb[18].mxu0 }
 0x47f   : > { %v1401_v56 = vpack.c.bf16 %v987_v52, %v987_v52  ;;  %v1490_v57 = vpop.f32.mrb[19].mxu0 }
 0x481   : > { %992 = vrot.lane.b32.xlu1 %v1401_v56, %s1932_s16 }
 0x484   : > { %v1099_v59 = vpop.f32.mrb[20].mxu0 }
 0x485   : > { %v1106_v60 = vmul.f32 %v1647_v58, %v1099_v59  ;;  %v1501_v61 = vpop.f32.mrb[21].mxu0 }
 0x486   : > { %v1102_v62 = vpop.f32.mrb[22].mxu0 }
 0x487   : > { %v1402_v63 = vpack.c.bf16 %v1106_v60, %v1106_v60  ;;  %v1502_v1 = vpop.f32.mrb[23].mxu0 }
 0x489   : > { %1111 = vrot.lane.b32.xlu1 %v1402_v63, %s1933_s27 }
 0x4eb   : > { %v874_v2 = vpop.permute.xlu0 %873 }
 0x4ec   : > { %877 = vst.msk [vmem:[#allocation2] sm:$0xf] %vm876_vm6, %v874_v2 }
 0x4f3   : > { %v993_v3 = vpop.permute.xlu1 %992 }
 0x4f4   : > { %996 = vst.msk [vmem:[#allocation2] sm:$0xf] %vm995_vm7, %v993_v3 }
 0x4fb   : > { %v1112_v0 = vpop.permute.xlu1 %1111 }
 0x4fc   : > { %1115 = vst.msk [vmem:[#allocation2] sm:$0xf] %vm1114_vm8, %v1112_v0 }
 0x503   : > { %v1116_v4 = vld [vmem:[#allocation2] sm:$0xf] }
 0x504   : > { %1508 = vmatmul.mubr.msk.bf16.vlgmr.msra.gmra.mrb[20].mxu1 %vm473_vm1, %v1116_v4 }
 0x5d7   : > { %v1177_v6 = vpop.f32.mrb[20].mxu1 }
 0x5d8   : > { %v1178_v7 = vadd.f32 %v1392_v5, %v1177_v6  ;;  %v1509_v8 = vpop.f32.mrb[21].mxu1 }
 0x5d9   : > { %v1180_v9 = vpop.f32.mrb[22].mxu1 }
 0x5da   : > { %v1510_v10 = vpop.f32.mrb[23].mxu1  ;;  %1183 = vst.msk [vmem:[%s452_s30] sm:$0xff] %vm473_vm1, %v1178_v7 }
 0x5db   : > { %1835 = shalt.err (!%p1832_p12)
}
 0x5dc   : > { %s1836_s3 = scalar_lea.hbm %s2362_s26, 128  ;;  %s1840_s24 = scalar_lea.hbm %s2487_s20, 256 }
 0x5dd   : > { %p1837_p8 = scmp.ne.s32.totalorder %s2362_s26, %s1836_s3  ;;  %p1841_p5 = scmp.lt.u32.totalorder %s2362_s26, %s2487_s20 }
 0x5de   : > { %p1842_p9 = scmp.lt.u32.totalorder %s1840_s24, %s1836_s3  ;;  %p1844_p4 = scmp.lt.u32.totalorder %s1836_s3, %s2362_s26 }
 0x5df   : > { %p1838_p11 = pnand %p1837_p8, %p2488_p7 }
 0x5e0   : > { %p1843_p2 = por %p1842_p9, %p1841_p5 }
 0x5e1   : > { %p1839_p10 = pneg %p1838_p11 }
 0x5e2   : > { %p1845_p3 = por %p1844_p4, %p1843_p2 }
 0x5e4   : > { %p1846_p1 = pnand %p1845_p3, %p1839_p10 }
 0x5e6   : > { %1849 = shalt.err (!%p1846_p1)
}
 0x5e7   : > { %1529 = dma.vmem_to_hbm [thread:$0]  (%p2488_p7), %s2364_s25, 128, %s2362_s26, %s1185_s11  }
 0x5e8 PF: > { %s2489_s27 = sld [smem:[#allocation20_spill]]  ;;  %s2490_s19 = sld [smem:[#allocation24_spill]] }
 0x5e9   : > { %s2491_s17 = sld [smem:[#allocation23_spill]] }
 0x5ee   : > { %s1211_s22 = sand.u32 1, %s2489_s27   ;;  %p2492_p13 = scmp.ne.s32.totalorder %s2490_s19, 0 }
 0x5ef   : > { %p2493_p6 = scmp.ge.s32.totalorder %s2491_s17, 2  ;;  %s1212_s8 = scalar_lea.sflag [#allocation5], %s1211_s22 }
 0x5f1   : > { %p1552_p0 = pnand %p2493_p6, %p2492_p13 }
 0x5f3   : > { %1891 = dma.done.wait (!%p1552_p0), %s1212_s8, 128  }
 0x5f4   : > { %1893 = vsyncadd (!%p1552_p0), %s1212_s8, 4294967168  ;;  %s29_s10 = sadd.s32 1, %s2491_s17   ;;  %s2494_s23 = sld [smem:[#allocation27_spill]] }
 0x5f5   : > { %p26_p12 = scmp.ge.s32.totalorder %s29_s10, 4   ;;  %s2495_s30 = sld [smem:[#allocation22_spill]] }
 0x5f6   : > { %s2496_s9 = sld [smem:[#allocation25_spill]]  ;;  %s2497_s27 = smov %s1900_s28 }
 0x5f7   : > { %s2498_s28 = smov %s1904_s29  ;;  %28 = sbr.rel (!%p26_p12) target bundleno = 15 (0xf), region = 133 }
 0x5fa   : > { %s2499_s29 = smov %s2494_s23 }
 0x5fe   :  { %1217 = vsyncpa [#allocation4], 1 }
 0x5ff   :  { %1219 = vsyncpa [#allocation4 + $0x1], 1 }
 0x600   :  { %1220 = vsyncpa [#allocation7], 1 }
 0x601   :  { %1222 = vsyncpa [#allocation7 + $0x1], 1 }
 0x602   :  { %1223 = vsyncpa [#allocation10], 1 }
 0x603   :  { %1224 = vsyncpa [#allocation13], 1 }
 0x604   :  { %1225 = vsyncpa [#allocation5], 1 }
 0x605   :  { %1227 = vsyncpa [#allocation5 + $0x1], 1 }

// kernel: tpu_custom_call.1
= control target key start
LH: loop header
LB: loop body
LE: loop exit
PB: predicated region body
PF: predicated region fallthrough
CT: control target
= control target key end

     0   :  { %s2412_s0 = inlined_call_operand.hbm [shape: bf16[2,8,32], index: 0, kind: input, shape index: {}]   ;;  %s2413_s1 = inlined_call_operand.hbm [shape: bf16[2,8,32], index: 1, kind: input, shape index: {}]   ;;  %s2414_s2 = inlined_call_operand.hbm [shape: bf16[2,8,32], index: 2, kind: input, shape index: {}]   ;;  %s2415_s3 = inlined_call_operand.hbm [shape: bf16[32,32], index: 3, kind: input, shape index: {}]   ;;  %s2416_s4 = inlined_call_operand.hbm [shape: bf16[32,32], index: 4, kind: input, shape index: {}]   ;;  %s2417_s5 = inlined_call_operand.vmem [shape: bf16[32,32], index: 5, kind: input, shape index: {}]   ;;  %s2418_s6 = inlined_call_operand.hbm [shape: bf16[32,32], index: 6, kind: input, shape index: {}]   ;;  %s2419_s7 = inlined_call_operand.vmem [shape: f32[1,32], index: 7, kind: input, shape index: {}]   ;;  %s2420_s8 = inlined_call_operand.hbm [shape: f32[2,8,32], index: 8, kind: output, shape index: {}]  }
   0x1   :  { %2447 = sst [smem:[#allocation28_spill]] %s2413_s1 }
   0x2   :  { %2448 = sst [smem:[#allocation29_spill]] %s2415_s3 }
   0x3   :  { %2449 = sst [smem:[#allocation30_spill]] %s2419_s7 }
   0x4   :  { %2450 = sst [smem:[#allocation31_spill]] %s2420_s8 }
   0x5   :  { %13 = vsyncpa [#allocation4], 0 }
   0x6   :  { %15 = vsyncpa [#allocation4 + $0x1], 0 }
   0x7   :  { %16 = vsyncpa [#allocation7], 0 }
   0x8   :  { %18 = vsyncpa [#allocation7 + $0x1], 0 }
   0x9   :  { %19 = vsyncpa [#allocation10], 0 }
   0xa   :  { %20 = vsyncpa [#allocation13], 0 }
   0xb   :  { %21 = vsyncpa [#allocation5], 0 }
   0xc   :  { %23 = vsyncpa [#allocation5 + $0x1], 0  ;;  %s1980_s27 = smov 0   ;;  %s1982_s28 = smov 0  }
   0xd   :  { %s1984_s29 = smov 0   ;;  %s1986_s30 = smov 0  }
   0xe   :  { %s1988_s9 = smov 0   ;;  %s1990_s10 = smov 0  }
   0xf LB: > { %2451 = sst [smem:[#allocation20_spill]] %s1896_s27  ;;  %s2011_s11 = sadd.s32 4294967295, %s1916_s10   ;;  %s1916_s10 = sphi %s1990_s10, %s29_s10   ;;  %s1912_s9 = sphi %s1988_s9, %s2496_s9   ;;  %s1908_s30 = sphi %s1986_s30, %s2495_s30   ;;  %s1904_s29 = sphi %s1984_s29, %s2499_s29   ;;  %s1900_s28 = sphi %s1982_s28, %s2498_s28   ;;  %s1896_s27 = sphi %s1980_s27, %s2497_s27  }
  0x10   : > { %2452 = sst [smem:[#allocation21_spill]] %s1908_s30  ;;  %s1352_s12 = sadd.s32 4294967294, %s1916_s10  }
  0x11   : > { %2453 = sst [smem:[#allocation22_spill]] %s1912_s9  ;;  %p63_p0 = scmp.ne.s32.totalorder %s1900_s28, %s1896_s27 }
  0x12   : > { %2454 = sst [smem:[#allocation23_spill]] %s1916_s10  ;;  %p2421_p1 = scmp.eq.s32.totalorder %s2011_s11, 0 }
  0x13   : > { %p252_p3 = scmp.eq.s32.totalorder %s1352_s12, 1  ;;  %p1353_p5 = scmp.ge.s32.totalorder %s1916_s10, 1 }
  0x14   : > { %p2020_p4 = por %p2421_p1, %p63_p0  ;;  %p259_p7 = scmp.lt.s32.totalorder %s1916_s10, 3 }
  0x15   : > { %p2025_p6 = por %p252_p3, %p63_p0  ;;  %s1918_s16 = smov [#allocation9]  }
  0x16   : > { %s2455_s13 = scalar_select %p2020_p4, 1, 0 }
  0x17   : > { %s2456_s14 = scalar_select %p2025_p6, 1, 0 }
  0x18   : > { %p2030_p8 = pnand %p1353_p5, %p259_p7  ;;  %s271_s17 = sshll.u32 %s1918_s16, 4  ;;  %s272_s17 = int_to_ptr.vmem [resolvable:$true] %s271_s17 }
  0x19   : > { %2457 = sst [smem:[#allocation24_spill]] %s2456_s14  ;;  %s41_s19 = sadd.s32 1, %s1912_s9 }
  0x1a   : > { %s2458_s15 = scalar_select %p2030_p8, 1, 0 }
  0x1b   : > { %p1531_p9 = pneg %p2030_p8  ;;  %s2460_s3 = sld [smem:[#allocation29_spill]] }
  0x1d   : > { %p2039_p11 = pnand %p1531_p9, %p2421_p1 }
  0x1f   : > { %s2459_s18 = scalar_select %p2039_p11, 1, 0 }
  0x20   : > { %p2052_p13 = pneg %p2039_p11 }
  0x21   : > { %s1648_s22 = scalar_lea.hbm %s2460_s3, 256 }
  0x22   : > { %p1649_p12 = scmp.ne.s32.totalorder %s2460_s3, %s1648_s22  ;;  %p1655_p5 = scmp.lt.u32.totalorder %s1648_s22, %s2460_s3 }
  0x23   : > { %s2461_s25 = scalar_select %p2052_p13, 1, 0 }
  0x24   : > { %p1651_p0 = pnand %p2052_p13, %p1649_p12 }
  0x26   : > { %p1652_p3 = pneg %p1651_p0 }
  0x28   : > { %p1657_p7 = pnand %p1655_p5, %p1652_p3 }
  0x2a   : > { %1660 = shalt.err (!%p1657_p7)
}
  0x2b   : > { %s1661_s16 = scalar_lea.vmem %s272_s17, 256  ;;  %p1669_p2 = scmp.lt.s32.totalorder %s272_s17, %s272_s17 }
  0x2c   : > { %p1662_p9 = scmp.ne.s32.totalorder %s272_s17, %s1661_s16  ;;  %p1670_p6 = scmp.lt.s32.totalorder %s1661_s16, %s1661_s16 }
  0x2e   : > { %p1664_p10 = pnand %p1662_p9, %p2052_p13  ;;  %p1671_p4 = por %p1670_p6, %p1669_p2 }
  0x30   : > { %p1665_p1 = pneg %p1664_p10 }
  0x32   : > { %p1672_p8 = pnand %p1671_p4, %p1665_p1 }
  0x34   : > { %1675 = shalt.err (!%p1672_p8)
}
  0x35   : > { %s2424_s20 = smov 64   ;;  %s2426_s21 = smov 4  }
  0x36   : > { %1534 = dma.hbm_to_vmem [thread:$0]  (!%p2039_p11), %s2460_s3, 256, %s272_s17, [#allocation10], %s2424_s20, %s2424_s20, %s2426_s21  }
  0x37   : > { %p43_p1 = scmp.ge.s32.totalorder %s41_s19, 2  ;;  %s50_s24 = sadd.s32 1, %s1904_s29 }
  0x38   : > { %p57_p2 = scmp.ne.s32.totalorder %s1904_s29, %s1900_s28  ;;  %p58_p4 = scmp.eq.s32.totalorder %s1916_s10, 0 }
  0x39   : > { %s2501_s19 = smov (%p43_p1, %s41_s19), 0  ;;  %p2463_p8 = scmp.eq.s32.totalorder %s2011_s11, 1 }
  0x3a   : > { %2462 = sst [smem:[#allocation25_spill]] %s2501_s19  ;;  %p59_p6 = por %p58_p4, %p57_p2 }
  0x3b   : > { %p2079_p10 = por %p2463_p8, %p57_p2  ;;  %s45_s12 = ssub.s32 %s1912_s9, %s2501_s19 }
  0x3c   : > { %p1558_p12 = scmp.lt.s32.totalorder %s1916_s10, 2  ;;  %p48_p0 = scmp.eq.s32.totalorder %s45_s12, 0 }
  0x3d   : > { %s2464_s26 = scalar_select %p2079_p10, 1, 0 }
  0x3e   : > { %s2429_s16 = sand.u32 1, %s1904_s29   ;;  %s2092_s22 = sshll.u32 %s1912_s9, 6 }
  0x3f   : > { %2465 = sst [smem:[#allocation26_spill]] %s2464_s26  ;;  %s2089_s17 = sshll.u32 %s2429_s16, 2 }
  0x40   : > { %s2095_s23 = scalar_select %p48_p0, %s1904_s29, %s50_s24  }
  0x41   : > { %p2097_p3 = pnand %p1558_p12, %p59_p6  ;;  %s336_s21 = sand.u32 1, %s1916_s10  }
  0x42   : > { %2466 = sst [smem:[#allocation27_spill]] %s2095_s23  ;;  %s2468_s1 = sld [smem:[#allocation28_spill]] }
  0x43   : > { %s2467_s20 = scalar_select %p2097_p3, 1, 0 }
  0x44   : > { %s340_s16 = scalar_lea.vmem [#allocation6], %s2089_s17  ;;  %s1921_s24 = smov [#allocation11]  }
  0x45   : > { %s347_s9 = sshll.u32 %s340_s16, 4  ;;  %s2111_s23 = sshll.u32 %s1921_s24, 4  ;;  %s2109_s9 = int_to_ptr.vmem [resolvable:$true] %s347_s9  ;;  %s285_s23 = int_to_ptr.vmem [resolvable:$true] %s2111_s23 }
  0x46   : > { %s2113_s14 = scalar_lea.sflag [#allocation7], %s336_s21  ;;  %p2119_p7 = pneg %p2097_p3 }
  0x48   : > { %s2106_s12 = scalar_lea.hbm %s2468_s1, %s2092_s22  ;;  %s1681_s10 = scalar_lea.hbm %s2468_s1, 128 }
  0x49   : > { %s1676_s27 = scalar_lea.hbm %s2106_s12, 64  ;;  %p1682_p2 = scmp.lt.u32.totalorder %s2106_s12, %s2468_s1 }
  0x4a   : > { %p1677_p5 = scmp.ne.s32.totalorder %s2106_s12, %s1676_s27  ;;  %p1683_p4 = scmp.lt.u32.totalorder %s1681_s10, %s1676_s27 }
  0x4b   : > { %s2469_s3 = scalar_select %p2119_p7, 1, 0 }
  0x4c   : > { %p1679_p9 = pnand %p2119_p7, %p1677_p5  ;;  %p1684_p6 = por %p1683_p4, %p1682_p2 }
  0x4d   : > { %p1685_p8 = scmp.lt.u32.totalorder %s1676_s27, %s2106_s12 }
  0x4e   : > { %p1680_p1 = pneg %p1679_p9 }
  0x4f   : > { %p1686_p12 = por %p1685_p8, %p1684_p6 }
  0x51   : > { %p1687_p0 = pnand %p1686_p12, %p1680_p1 }
  0x53   : > { %1690 = shalt.err (!%p1687_p0)
}
  0x54   : > { %s1691_s21 = scalar_lea.vmem %s2109_s9, 64  ;;  %s1922_s19 = smov [#allocation6]  }
  0x55   : > { %p1692_p5 = scmp.ne.s32.totalorder %s2109_s9, %s1691_s21  ;;  %s1696_s16 = sshll.u32 %s1922_s19, 4  ;;  %s1697_s16 = int_to_ptr.vmem [resolvable:$false] %s1696_s16 }
  0x56   : > { %s1698_s8 = scalar_lea.vmem %s1697_s16, 128  ;;  %p1699_p11 = scmp.lt.s32.totalorder %s2109_s9, %s1697_s16 }
  0x57   : > { %p1694_p9 = pnand %p1692_p5, %p2119_p7  ;;  %p1700_p13 = scmp.lt.s32.totalorder %s1698_s8, %s1691_s21 }
  0x59   : > { %p1695_p10 = pneg %p1694_p9  ;;  %p1701_p2 = por %p1700_p13, %p1699_p11 }
  0x5b   : > { %p1702_p4 = pnand %p1701_p2, %p1695_p10 }
  0x5d   : > { %1705 = shalt.err (!%p1702_p4)
}
  0x5e   : > { %1547 = dma.hbm_to_vmem [thread:$0]  (!%p2097_p3), %s2106_s12, 64, %s2109_s9, %s2113_s14  }
  0x5f   : > { %s1706_s24 = scalar_lea.hbm %s2416_s4, 256  ;;  %p2470_p11 = scmp.ne.s32.totalorder %s2461_s25, 0 }
  0x60   : > { %p1707_p1 = scmp.ne.s32.totalorder %s2416_s4, %s1706_s24  ;;  %p1713_p6 = scmp.lt.u32.totalorder %s1706_s24, %s2416_s4 }
  0x62   : > { %p1709_p13 = pnand %p1707_p1, %p2470_p11 }
  0x64   : > { %p1710_p10 = pneg %p1709_p13 }
  0x66   : > { %p1715_p8 = pnand %p1713_p6, %p1710_p10 }
  0x68   : > { %1718 = shalt.err (!%p1715_p8)
}
  0x69   : > { %s1719_s8 = scalar_lea.vmem %s285_s23, 256  ;;  %p1727_p9 = scmp.lt.s32.totalorder %s285_s23, %s285_s23 }
  0x6a   : > { %p1720_p12 = scmp.ne.s32.totalorder %s285_s23, %s1719_s8  ;;  %p1728_p2 = scmp.lt.s32.totalorder %s1719_s8, %s1719_s8 }
  0x6c   : > { %p1722_p0 = pnand %p1720_p12, %p2470_p11  ;;  %p1729_p4 = por %p1728_p2, %p1727_p9 }
  0x6e   : > { %p1723_p5 = pneg %p1722_p0 }
  0x70   : > { %p1730_p3 = pnand %p1729_p4, %p1723_p5 }
  0x72   : > { %1733 = shalt.err (!%p1730_p3)
}
  0x73   : > { %p2471_p1 = scmp.ne.s32.totalorder %s2459_s18, 0  ;;  %s2472_s1 = smov 4  }
  0x74   : > { %s2473_s9 = smov 64   ;;  %s1923_s10 = smov [#allocation12]  }
  0x75   : > { %1537 = dma.hbm_to_vmem [thread:$0]  (!%p2471_p1), %s2416_s4, 256, %s285_s23, [#allocation10], %s2473_s9, %s2473_s9, %s2472_s1  }
  0x76   : > { %s300_s24 = sshll.u32 %s1923_s10, 4  ;;  %s1734_s16 = scalar_lea.hbm %s2418_s6, 256  ;;  %s301_s24 = int_to_ptr.vmem [resolvable:$true] %s300_s24 }
  0x77   : > { %p1735_p3 = scmp.ne.s32.totalorder %s2418_s6, %s1734_s16  ;;  %p1741_p6 = scmp.lt.u32.totalorder %s1734_s16, %s2418_s6 }
  0x79   : > { %p1737_p13 = pnand %p1735_p3, %p2470_p11 }
  0x7b   : > { %p1738_p10 = pneg %p1737_p13 }
  0x7d   : > { %p1743_p8 = pnand %p1741_p6, %p1738_p10 }
  0x7f   : > { %1746 = shalt.err (!%p1743_p8)
}
  0x80   : > { %s1747_s23 = scalar_lea.vmem %s301_s24, 256  ;;  %p1755_p9 = scmp.lt.s32.totalorder %s301_s24, %s301_s24 }
  0x81   : > { %p1748_p12 = scmp.ne.s32.totalorder %s301_s24, %s1747_s23  ;;  %p1756_p2 = scmp.lt.s32.totalorder %s1747_s23, %s1747_s23 }
  0x83   : > { %p1750_p0 = pnand %p1748_p12, %p2470_p11  ;;  %p1757_p4 = por %p1756_p2, %p1755_p9 }
  0x85   : > { %p1751_p5 = pneg %p1750_p0 }
  0x87   : > { %p1758_p7 = pnand %p1757_p4, %p1751_p5 }
  0x89   : > { %1761 = shalt.err (!%p1758_p7)
}
  0x8a   : > { %1540 = dma.hbm_to_vmem [thread:$0]  (!%p2471_p1), %s2418_s6, 256, %s301_s24, [#allocation13], %s2473_s9, %s2473_s9, %s2472_s1  }
  0x8b   : > { %s2190_s12 = scalar_lea.hbm %s2412_s0, %s2092_s22  ;;  %s321_s18 = scalar_lea.vmem [#allocation3], %s2089_s17 }
  0x8c   : > { %s329_s27 = sshll.u32 %s321_s18, 4  ;;  %s2474_s10 = sand.u32 1, %s1904_s29   ;;  %s330_s27 = int_to_ptr.vmem [resolvable:$true] %s329_s27 }
  0x8d   : > { %s318_s19 = scalar_lea.sflag [#allocation4], %s2474_s10  ;;  %s1762_s21 = scalar_lea.hbm %s2190_s12, 64 }
  0x8e   : > { %p1763_p7 = scmp.ne.s32.totalorder %s2190_s12, %s1762_s21  ;;  %p2475_p11 = scmp.ne.s32.totalorder %s2469_s3, 0 }
  0x8f   : > { %s1767_s24 = scalar_lea.hbm %s2412_s0, 128  ;;  %p1768_p1 = scmp.lt.u32.totalorder %s2190_s12, %s2412_s0 }
  0x90   : > { %p1765_p3 = pnand %p1763_p7, %p2475_p11  ;;  %p1769_p10 = scmp.lt.u32.totalorder %s1767_s24, %s1762_s21 }
  0x91   : > { %p1771_p8 = scmp.lt.u32.totalorder %s1762_s21, %s2190_s12 }
  0x92   : > { %p1766_p13 = pneg %p1765_p3  ;;  %p1770_p6 = por %p1769_p10, %p1768_p1 }
  0x94   : > { %p1772_p12 = por %p1771_p8, %p1770_p6 }
  0x96   : > { %p1773_p0 = pnand %p1772_p12, %p1766_p13 }
  0x98   : > { %1776 = shalt.err (!%p1773_p0)
}
  0x99   : > { %s1777_s23 = scalar_lea.vmem %s330_s27, 64  ;;  %s1924_s7 = smov [#allocation3]  }
  0x9a   : > { %p1778_p5 = scmp.ne.s32.totalorder %s330_s27, %s1777_s23  ;;  %s1782_s30 = sshll.u32 %s1924_s7, 4  ;;  %s1783_s30 = int_to_ptr.vmem [resolvable:$false] %s1782_s30 }
  0x9b   : > { %s1784_s25 = scalar_lea.vmem %s1783_s30, 128  ;;  %p1785_p4 = scmp.lt.s32.totalorder %s330_s27, %s1783_s30 }
  0x9c   : > { %p1780_p9 = pnand %p1778_p5, %p2475_p11  ;;  %p1786_p7 = scmp.lt.s32.totalorder %s1784_s25, %s1777_s23 }
  0x9e   : > { %p1781_p2 = pneg %p1780_p9  ;;  %p1787_p3 = por %p1786_p7, %p1785_p4 }
  0xa0   : > { %p1788_p1 = pnand %p1787_p3, %p1781_p2 }
  0xa2   : > { %1791 = shalt.err (!%p1788_p1)
}
  0xa3   : > { %p2476_p10 = scmp.ne.s32.totalorder %s2467_s20, 0  ;;  %s2216_s10 = scalar_lea.hbm %s2414_s2, %s2092_s22 }
  0xa4   : > { %s358_s21 = scalar_lea.vmem [#allocation8], %s2089_s17  ;;  %s1792_s9 = scalar_lea.hbm %s2216_s10, 64 }
  0xa5   : > { %1544 = dma.hbm_to_vmem [thread:$0]  (!%p2476_p10), %s2190_s12, 64, %s330_s27, %s318_s19  }
  0xa6   : > { %s365_s1 = sshll.u32 %s358_s21, 4  ;;  %p1793_p13 = scmp.ne.s32.totalorder %s2216_s10, %s1792_s9  ;;  %s366_s1 = int_to_ptr.vmem [resolvable:$true] %s365_s1 }
  0xa7   : > { %s1797_s12 = scalar_lea.hbm %s2414_s2, 128  ;;  %p1798_p12 = scmp.lt.u32.totalorder %s2216_s10, %s2414_s2 }
  0xa8   : > { %p1795_p6 = pnand %p1793_p13, %p2475_p11  ;;  %p1799_p0 = scmp.lt.u32.totalorder %s1797_s12, %s1792_s9 }
  0xa9   : > { %p1801_p9 = scmp.lt.u32.totalorder %s1792_s9, %s2216_s10 }
  0xaa   : > { %p1796_p8 = pneg %p1795_p6  ;;  %p1800_p5 = por %p1799_p0, %p1798_p12 }
  0xac   : > { %p1802_p2 = por %p1801_p9, %p1800_p5 }
  0xae   : > { %p1803_p4 = pnand %p1802_p2, %p1796_p8 }
  0xb0   : > { %1806 = shalt.err (!%p1803_p4)
}
  0xb1   : > { %s1807_s17 = scalar_lea.vmem %s366_s1, 64  ;;  %s1925_s22 = smov [#allocation8]  }
  0xb2   : > { %p1808_p7 = scmp.ne.s32.totalorder %s366_s1, %s1807_s17  ;;  %s1812_s8 = sshll.u32 %s1925_s22, 4  ;;  %s1813_s8 = int_to_ptr.vmem [resolvable:$false] %s1812_s8 }
  0xb3   : > { %s1814_s23 = scalar_lea.vmem %s1813_s8, 128  ;;  %p1815_p13 = scmp.lt.s32.totalorder %s366_s1, %s1813_s8 }
  0xb4   : > { %p1810_p3 = pnand %p1808_p7, %p2475_p11  ;;  %p1816_p6 = scmp.lt.s32.totalorder %s1814_s23, %s1807_s17 }
  0xb6   : > { %p1811_p1 = pneg %p1810_p3  ;;  %p1817_p10 = por %p1816_p6, %p1815_p13 }
  0xb8   : > { %p1818_p0 = pnand %p1817_p10, %p1811_p1 }
  0xba   : > { %1821 = shalt.err (!%p1818_p0)
}
  0xbb   : > { %p2477_p12 = scmp.ne.s32.totalorder %s2467_s20, 0  ;;  %p2478_p8 = scmp.ne.s32.totalorder %s2458_s15, 0 }
  0xbc   : > { %s2240_s3 = sand.u32 (!%p2478_p8), 1, %s1900_s28   ;;  %p2479_p11 = scmp.ne.s32.totalorder (!%p2478_p8), %s2455_s13, 0 }
  0xbd   : > { %1550 = dma.hbm_to_vmem [thread:$0]  (!%p2477_p12), %s2216_s10, 64, %s366_s1, %s2113_s14  }
  0xbe   : > { %374 = sbr.rel (%p2478_p8) target bundleno = 1512 (0x5e8), region = 52  ;;  %s2243_s7 = sshll.u32 (!%p2478_p8), %s2240_s3, 2 }
  0xbf   : > { %s377_s30 = scalar_lea.sflag (!%p2478_p8), [#allocation4], %s2240_s3  ;;  %s380_s25 = scalar_lea.vmem (!%p2478_p8), [#allocation3], %s2243_s7 }
  0xc5   : > { %1875 = dma.done.wait (%p2479_p11), %s377_s30, 64  }
  0xc6   : > { %1877 = vsyncadd (%p2479_p11), %s377_s30, 4294967232  ;;  %s385_s14 = sand.u32 1, %s2011_s11   ;;  %s389_s20 = scalar_lea.vmem [#allocation6], %s2243_s7 }
  0xc7   : > { %s386_s15 = scalar_lea.sflag [#allocation7], %s385_s14 }
  0xc8   : > { %1879 = dma.done.wait (%p2479_p11), %s386_s15, 128  }
  0xc9   : > { %1881 = vsyncadd (%p2479_p11), %s386_s15, 4294967168  ;;  %s398_s26 = scalar_lea.vmem [#allocation8], %s2243_s7  ;;  %p2480_p10 = scmp.eq.s32.totalorder %s2011_s11, 0 }
  0xcb   : > { %1883 = dma.done.wait (%p2480_p10), [#allocation10], 512   ;;  %p2481_p5 = pmov %p2480_p10 }
  0xcd   : > { %1885 = vsyncadd (%p2481_p5), [#allocation10], 4294966784  ;;  %p2482_p9 = pmov %p2481_p5 }
  0xce   : > { %p2483_p2 = pmov %p2481_p5 }
  0xcf   : > { %1887 = dma.done.wait (%p2482_p9), [#allocation13], 256  }
  0xd0   : > { %1889 = vsyncadd (%p2483_p2), [#allocation13], 4294967040  ;;  %v1926_v0 = vmov 0.0   ;;  %vm1927_vm0 = vmmov 0   ;;  %v1624_v1 = vld [vmem:[#allocation11] sm:$0xff]   ;;  %v1625_v2 = vld [vmem:[#allocation9] sm:$0xff]   ;;  %v639_v30 = vlaneseq }
  0xd1   : > { %1439 = vmatprep.subr.bf16.mxu1 %v1926_v0  ;;  %1431 = vmatprep.subr.bf16.mxu0 %v1926_v0  ;;  %v1626_v3 = vld [vmem:[#allocation11 + $0x8] sm:$0xff]   ;;  %v455_v4 = vld [vmem:[%s389_s20] sm:$0xf]  ;;  %vm473_vm1 = vcmask 261120   ;;  %v1627_v5 = vld [vmem:[#allocation9 + $0x8] sm:$0xff]   ;;  %vm647_vm2 = vcmask 64512  }
  0xd2   : > { %1443 = vmatprep.mubr.msk.bf16.mxu1 %vm1927_vm0, %v1926_v0  ;;  %1435 = vmatprep.mubr.msk.bf16.mxu0 %vm1927_vm0, %v1926_v0  ;;  %v454_v6 = vld [vmem:[%s380_s25] sm:$0xf]  ;;  %s1928_s11 = smov 112   ;;  %s1929_s13 = smov 120   ;;  %v1628_v18 = vld [vmem:[%s2417_s5] sm:$0xff]   ;;  %v1629_v19 = vld [vmem:[%s2417_s5 + $0x8] sm:$0xff]  }
  0xd3   : > { %1440 = vmatpush3.bf16.msra.mxu1 %v1624_v1  ;;  %1432 = vmatpush3.bf16.msra.mxu0 %v1625_v2  ;;  %s1930_s18 = smov 104   ;;  %v456_v20 = vld [vmem:[%s398_s26] sm:$0xf]  ;;  %v640_v31 = vshrl.u32 %v639_v30, 7  ;;  %v644_v32 = vand.u32 127, %v639_v30  ;;  %vm707_vm4 = vcmask 1043456  }
  0xd4   : > { %1441 = vmatprep.subr.bf16.mxu1 %v1926_v0  ;;  %1433 = vmatprep.subr.bf16.mxu0 %v1926_v0  ;;  %vm754_vm5 = vcmask 60416   ;;  %s1931_s24 = smov 8   ;;  %s1932_s16 = smov 16   ;;  %vm876_vm6 = vcmask 126016   ;;  %vm995_vm7 = vcmask 191616   ;;  %vm1114_vm8 = vcmask 257216  }
  0xd5   : > { %vm645_vm3 = vcmp.gt.s32.totalorder %v644_v32, %v640_v31  ;;  %s2484_s12 = sld [smem:[#allocation21_spill]]  ;;  %s1933_s27 = smov 24  }
  0xd6   : > { %v646_v33 = vsel %vm645_vm3, -1e+13, %v1926_v0  ;;  %s1371_s19 = sshll.u32 %s2240_s3, 3  ;;  %s2485_s8 = sld [smem:[#allocation30_spill]] }
  0xd7   : > { %1442 = vmatpush3.bf16.msra.mxu1 %v1626_v3  ;;  %1434 = vmatpush3.bf16.msra.mxu0 %v1627_v5  ;;  %s2486_s23 = sld [smem:[#allocation26_spill]]  ;;  %s452_s30 = scalar_lea.vmem [#allocation14], %s1371_s19 }
  0xd8   : > { %1455 = vmatprep.subr.bf16.mxu1 %v1926_v0  ;;  %1447 = vmatprep.subr.bf16.mxu0 %v1926_v0  ;;  %s1199_s25 = sshll.u32 %s452_s30, 4  ;;  %s2487_s20 = sld [smem:[#allocation31_spill]]  ;;  %s2364_s25 = int_to_ptr.vmem [resolvable:$true] %s1199_s25 }
  0xda   : > { %1444 = vmatmul.mubr.msk.bf16.vlgmr.msra.gmra.mrb[0].mxu1 %vm473_vm1, %v455_v4  ;;  %1436 = vmatmul.mubr.msk.bf16.vlgmr.msra.gmra.mrb[0].mxu0 %vm473_vm1, %v454_v6 }
  0xdb   : > { %1457 = vmatprep.mubr.msk.bf16.mxu1 %vm1927_vm0, %v1926_v0  ;;  %1451 = vmatprep.mubr.msk.bf16.mxu0 %vm1927_vm0, %v1926_v0  ;;  %s1397_s7 = sshll.u32 %s2484_s12, 7 }
  0xdc   : > { %1448 = vmatpush3.bf16.msra.mxu0 %v1628_v18 }
  0xdd   : > { %1449 = vmatprep.subr.bf16.mxu0 %v1926_v0  ;;  %p2488_p7 = scmp.ne.s32.totalorder %s2486_s23, 0 }
  0xde   : > { %s2362_s26 = scalar_lea.hbm %s2487_s20, %s1397_s7 }
  0xe0   : > { %1450 = vmatpush3.bf16.msra.mxu0 %v1629_v19 }
  0xe1   : > { %1461 = vmatprep.subr.bf16.mxu0 %v1926_v0 }
  0xe3   : > { %1452 = vmatmul.mubr.msk.bf16.vlgmr.msra.gmra.mrb[4].mxu0 %vm473_vm1, %v456_v20 }
  0xe4   : > { %1463 = vmatprep.mubr.msk.bf16.mxu0 %vm1927_vm0, %v1926_v0 }
 0x1ad   : > { %v571_v7 = vpop.f32.mrb[0].mxu1  ;;  %v511_v10 = vpop.f32.mrb[0].mxu0 }
 0x1ae   : > { %v577_v8 = vpack.c.bf16 %v571_v7, %v571_v7  ;;  %v1445_v9 = vpop.f32.mrb[1].mxu1  ;;  %v1437_v12 = vpop.f32.mrb[1].mxu0  ;;  %v517_v14 = vpack.c.bf16 %v511_v10, %v511_v10 }
 0x1af   : > { %v574_v11 = vpop.f32.mrb[2].mxu1  ;;  %v514_v16 = vpop.f32.mrb[2].mxu0 }
 0x1b0   : > { %880 = vrot.lane.b32.xlu1 %v577_v8, %s1928_s11  ;;  %760 = vrot.lane.b32.xlu0 %v577_v8, %s1929_s13  ;;  %v1446_v13 = vpop.f32.mrb[3].mxu1  ;;  %v652_v15 = vsel %vm647_vm2, %v577_v8, 0  ;;  %v1438_v17 = vpop.f32.mrb[3].mxu0 }
 0x1b1   : > { %1456 = vmatpush3.bf16.xpose.msra.mxu1 %v652_v15 }
 0x1b2   : > { %1467 = vmatprep.subr.bf16.mxu1 %v1926_v0 }
 0x1b4   : > { %878 = vrot.lane.b32.xlu1 %v517_v14, %s1928_s11  ;;  %757 = vrot.lane.b32.xlu0 %v517_v14, %s1929_s13 }
 0x1b6   : > { %v631_v40 = vpop.f32.mrb[4].mxu0 }
 0x1b7   : > { %v1453_v41 = vpop.f32.mrb[5].mxu0  ;;  %v637_v44 = vpack.c.bf16 %v631_v40, %v631_v40 }
 0x1b8   : > { %997 = vrot.lane.b32.xlu1 %v517_v14, %s1930_s18  ;;  %999 = vrot.lane.b32.xlu0 %v577_v8, %s1930_s18  ;;  %v634_v42 = vpop.f32.mrb[6].mxu0 }
 0x1b9   : > { %1458 = vmatmul.mubr.msk.bf16.vlgmr.msra.gmra.mrb[4].mxu1 %vm647_vm2, %v517_v14  ;;  %v1454_v43 = vpop.f32.mrb[7].mxu0  ;;  %v709_v45 = vsel %vm707_vm4, %v637_v44, 0 }
 0x1ba   : > { %1469 = vmatprep.mubr.msk.bf16.mxu1 %vm1927_vm0, %v1926_v0  ;;  %1462 = vmatpush3.bf16.msra.mxu0 %v709_v45 }
 0x1bb   : > { %1473 = vmatprep.subr.bf16.mxu0 %v1926_v0 }
 0x222   : > { %v761_v21 = vpop.permute.xlu0 %760  ;;  %v881_v23 = vpop.permute.xlu1 %880 }
 0x223   : > { %v766_v22 = vsel %vm647_vm2, %v761_v21, 0  ;;  %v886_v25 = vsel %vm647_vm2, %v881_v23, 0 }
 0x224   : > { %1468 = vmatpush3.bf16.xpose.msra.mxu1 %v766_v22 }
 0x225   : > { %1479 = vmatprep.subr.bf16.mxu1 %v1926_v0 }
 0x226   : > { %v758_v24 = vpop.permute.xlu0 %757  ;;  %v879_v27 = vpop.permute.xlu1 %878 }
 0x22a   : > { %v1000_v26 = vpop.permute.xlu0 %999  ;;  %v998_v29 = vpop.permute.xlu1 %997 }
 0x22b   : > { %1470 = vmatmul.mubr.msk.bf16.vlgmr.msra.gmra.mrb[8].mxu1 %vm647_vm2, %v758_v24  ;;  %v1005_v28 = vsel %vm647_vm2, %v1000_v26, 0 }
 0x22c   : > { %1480 = vmatpush3.bf16.xpose.msra.mxu1 %v886_v25  ;;  %1481 = vmatprep.mubr.msk.bf16.mxu1 %vm1927_vm0, %v1926_v0 }
 0x22d   : > { %1491 = vmatprep.subr.bf16.mxu1 %v1926_v0 }
 0x233   : > { %1482 = vmatmul.mubr.msk.bf16.vlgmr.msra.gmra.mrb[12].mxu1 %vm647_vm2, %v879_v27 }
 0x234   : > { %1492 = vmatpush3.bf16.xpose.msra.mxu1 %v1005_v28  ;;  %1493 = vmatprep.mubr.msk.bf16.mxu1 %vm1927_vm0, %v1926_v0 }
 0x235   : > { %1503 = vmatprep.subr.bf16.mxu1 %v1926_v0 }
 0x23b   : > { %1494 = vmatmul.mubr.msk.bf16.vlgmr.msra.gmra.mrb[16].mxu1 %vm647_vm2, %v998_v29 }
 0x23c   : > { %1507 = vmatprep.mubr.msk.bf16.mxu1 %vm1927_vm0, %v1926_v0 }
 0x28c   : > { %v688_v34 = vpop.f32.mrb[4].mxu1 }
 0x28d   : > { %v689_v35 = vadd.f32 %v688_v34, %v646_v33  ;;  %v1459_v36 = vpop.f32.mrb[5].mxu1 }
 0x28e   : > { %v691_v37 = vpop.f32.mrb[6].mxu1 }
 0x28f   : > { %v1460_v38 = vpop.f32.mrb[7].mxu1  ;;  %v694_v39 = vsel %vm647_vm2, %v689_v35, -inf }
 0x290   : > { %695 = vmax.xlane.f32.xlu0 %v694_v39 }
 0x2fe   : > { %v802_v46 = vpop.f32.mrb[8].mxu1 }
 0x2ff   : > { %v803_v47 = vadd.f32 %v802_v46, %v646_v33  ;;  %v1471_v48 = vpop.f32.mrb[9].mxu1 }
 0x300   : > { %v805_v49 = vpop.f32.mrb[10].mxu1 }
 0x301   : > { %v1472_v50 = vpop.f32.mrb[11].mxu1  ;;  %v808_v51 = vsel %vm647_vm2, %v803_v47, -inf }
 0x302   : > { %809 = vmax.xlane.f32.xlu1 %v808_v51  ;;  %v1630_v51 = vld [vmem:[#allocation12] sm:$0xff]  }
 0x303   : > { %1504 = vmatpush3.bf16.msra.mxu1 %v1630_v51 }
 0x304   : > { %1505 = vmatprep.subr.bf16.mxu1 %v1926_v0 }
 0x306   : > { %v922_v52 = vpop.f32.mrb[12].mxu1 }
 0x307   : > { %v923_v53 = vadd.f32 %v922_v52, %v646_v33  ;;  %v1483_v54 = vpop.f32.mrb[13].mxu1 }
 0x308   : > { %v925_v55 = vpop.f32.mrb[14].mxu1 }
 0x309   : > { %v1484_v56 = vpop.f32.mrb[15].mxu1  ;;  %v928_v57 = vsel %vm647_vm2, %v923_v53, -inf  ;;  %v1631_v55 = vld [vmem:[#allocation12 + $0x8] sm:$0xff]  }
 0x30a   : > { %929 = vmax.xlane.f32.xlu0 %v928_v57  ;;  %1506 = vmatpush3.bf16.msra.mxu1 %v1631_v55 }
 0x30e   : > { %v1041_v58 = vpop.f32.mrb[16].mxu1 }
 0x30f   : > { %v1042_v59 = vadd.f32 %v1041_v58, %v646_v33  ;;  %v1495_v60 = vpop.f32.mrb[17].mxu1 }
 0x310   : > { %v1044_v61 = vpop.f32.mrb[18].mxu1 }
 0x311   : > { %v1496_v62 = vpop.f32.mrb[19].mxu1  ;;  %v1047_v63 = vsel %vm647_vm2, %v1042_v59, -inf }
 0x312   : > { %1048 = vmax.xlane.f32.xlu0 %v1047_v63 }
 0x313   : > { %819 = vrot.lane.b32.xlu1 %v637_v44, %s1929_s13  ;;  %s1822_s13 = scalar_lea.vmem %s2364_s25, 128 }
 0x314   : > { %p1823_p4 = scmp.ne.s32.totalorder %s2364_s25, %s1822_s13 }
 0x316   : > { %p1824_p3 = pnand %p1823_p4, %p2488_p7 }
 0x317   : > { %1057 = vrot.lane.b32.xlu1 %v637_v44, %s1930_s18  ;;  %s1934_s18 = smov [#allocation14]  }
 0x318   : > { %p1825_p1 = pneg %p1824_p3  ;;  %s1826_s10 = sshll.u32 %s1934_s18, 4  ;;  %s1827_s10 = int_to_ptr.vmem [resolvable:$false] %s1826_s10 }
 0x319   : > { %s1828_s21 = scalar_lea.vmem %s1827_s10, 256  ;;  %p1829_p13 = scmp.lt.s32.totalorder %s2364_s25, %s1827_s10 }
 0x31a   : > { %p1830_p6 = scmp.lt.s32.totalorder %s1828_s21, %s1822_s13 }
 0x31c   : > { %p1831_p0 = por %p1830_p6, %p1829_p13 }
 0x31d   : > { %v696_v1 = vpop.xlane.xlu0 %695 }
 0x31e   : > { %v697_v2 = vsub.f32 %v689_v35, %v696_v1  ;;  %p1832_p12 = pnand %p1831_p0, %p1825_p1 }
 0x320   : > { %v698_v3 = vmul.f32 1.442695, %v697_v2 }
 0x322   : > { %1632 = vpow2.f32 %v698_v3 }
 0x328   : > { %938 = vrot.lane.b32.xlu0 %v637_v44, %s1928_s11  ;;  %s1185_s11 = scalar_lea.sflag [#allocation5], %s2240_s3 }
 0x32c   : > { %v1633_v4 = vpop.eup %1632 }
 0x32d   : > { %v703_v5 = vpack.c.bf16 %v1633_v4, %v1633_v4  ;;  %v700_v21 = vsel %vm647_vm2, %v1633_v4, 0.0 }
 0x32f   : > { %1464 = vmatmul.mubr.msk.bf16.vlgmr.msra.gmra.mrb[8].mxu0 %vm647_vm2, %v703_v5  ;;  %v1392_v5 = vld [vmem:[%s2485_s8] ss:$0 sm:$0xff] }
 0x330   : > { %1475 = vmatprep.mubr.msk.bf16.mxu0 %vm1927_vm0, %v1926_v0 }
 0x38f   : > { %v810_v6 = vpop.xlane.xlu1 %809 }
 0x390   : > { %v811_v7 = vsub.f32 %v803_v47, %v810_v6 }
 0x392   : > { %v812_v8 = vmul.f32 1.442695, %v811_v7 }
 0x393   : > { %v820_v9 = vpop.permute.xlu1 %819 }
 0x394   : > { %1634 = vpow2.f32 %v812_v8  ;;  %v825_v10 = vsel %vm707_vm4, %v820_v9, 0 }
 0x395   : > { %1474 = vmatpush3.bf16.msra.mxu0 %v825_v10 }
 0x396   : > { %1485 = vmatprep.subr.bf16.mxu0 %v1926_v0 }
 0x397   : > { %v930_v11 = vpop.xlane.xlu0 %929  ;;  %v1058_v24 = vpop.permute.xlu1 %1057 }
 0x398   : > { %v931_v12 = vsub.f32 %v923_v53, %v930_v11  ;;  %v1063_v27 = vsel %vm707_vm4, %v1058_v24, 0 }
 0x39a   : > { %v932_v13 = vmul.f32 1.442695, %v931_v12 }
 0x39c   : > { %1636 = vpow2.f32 %v932_v13 }
 0x39e   : > { %v1635_v14 = vpop.eup %1634 }
 0x39f   : > { %v1049_v15 = vpop.xlane.xlu0 %1048  ;;  %v814_v16 = vsel %vm647_vm2, %v1635_v14, 0.0  ;;  %v817_v17 = vpack.c.bf16 %v1635_v14, %v1635_v14 }
 0x3a0   : > { %v1050_v18 = vsub.f32 %v1042_v59, %v1049_v15  ;;  %815 = vadd.xlane.f32.xlu1 %v814_v16 }
 0x3a1   : > { %1476 = vmatmul.mubr.msk.bf16.vlgmr.msra.gmra.mrb[12].mxu0 %vm647_vm2, %v817_v17 }
 0x3a2   : > { %v1051_v19 = vmul.f32 1.442695, %v1050_v18  ;;  %1487 = vmatprep.mubr.msk.bf16.mxu0 %vm1927_vm0, %v1926_v0 }
 0x3a3   : > { %v939_v20 = vpop.permute.xlu0 %938 }
 0x3a4   : > { %1638 = vpow2.f32 %v1051_v19  ;;  %v944_v22 = vsel %vm707_vm4, %v939_v20, 0  ;;  %701 = vadd.xlane.f32.xlu1 %v700_v21 }
 0x3a5   : > { %1486 = vmatpush3.bf16.msra.mxu0 %v944_v22 }
 0x3a6   : > { %v1637_v23 = vpop.eup %1636  ;;  %1497 = vmatprep.subr.bf16.mxu0 %v1926_v0 }
 0x3a7   : > { %v934_v25 = vsel %vm647_vm2, %v1637_v23, 0.0  ;;  %v937_v26 = vpack.c.bf16 %v1637_v23, %v1637_v23 }
 0x3a8   : > { %935 = vadd.xlane.f32.xlu0 %v934_v25 }
 0x3a9   : > { %1488 = vmatmul.mubr.msk.bf16.vlgmr.msra.gmra.mrb[16].mxu0 %vm647_vm2, %v937_v26 }
 0x3aa   : > { %1498 = vmatpush3.bf16.msra.mxu0 %v1063_v27  ;;  %1499 = vmatprep.mubr.msk.bf16.mxu0 %vm1927_vm0, %v1926_v0 }
 0x3ae   : > { %v1639_v28 = vpop.eup %1638 }
 0x3af   : > { %v1053_v29 = vsel %vm647_vm2, %v1639_v28, 0.0  ;;  %v1056_v30 = vpack.c.bf16 %v1639_v28, %v1639_v28 }
 0x3b0   : > { %1054 = vadd.xlane.f32.xlu0 %v1053_v29 }
 0x3b1   : > { %1500 = vmatmul.mubr.msk.bf16.vlgmr.msra.gmra.mrb[20].mxu0 %vm647_vm2, %v1056_v30 }
 0x402   : > { %v745_v31 = vpop.f32.mrb[8].mxu0 }
 0x403   : > { %v1465_v32 = vpop.f32.mrb[9].mxu0 }
 0x404   : > { %v748_v33 = vpop.f32.mrb[10].mxu0 }
 0x405   : > { %v1466_v34 = vpop.f32.mrb[11].mxu0 }
 0x42d   : > { %v816_v35 = vpop.xlane.xlu1 %815 }
 0x431   : > { %v702_v36 = vpop.xlane.xlu1 %701 }
 0x432   : > { %1640 = vrcp.f32 %v702_v36 }
 0x433   : > { %1642 = vrcp.f32 %v816_v35 }
 0x435   : > { %v936_v40 = vpop.xlane.xlu0 %935 }
 0x436   : > { %1644 = vrcp.f32 %v936_v40 }
 0x43c   : > { %v1641_v37 = vpop.eup %1640 }
 0x43d   : > { %v752_v38 = vmul.f32 %v1641_v37, %v745_v31  ;;  %v1643_v41 = vpop.eup %1642  ;;  %v1055_v46 = vpop.xlane.xlu0 %1054 }
 0x43e   : > { %1646 = vrcp.f32 %v1055_v46 }
 0x43f   : > { %v753_v39 = vpack.c.bf16 %v752_v38, %v752_v38 }
 0x440   : > { %v1645_v49 = vpop.eup %1644 }
 0x441   : > { %755 = vst.msk [vmem:[#allocation2] sm:$0xf] %vm754_vm5, %v753_v39 }
 0x448   : > { %v1647_v58 = vpop.eup %1646 }
 0x474   : > { %v861_v42 = vpop.f32.mrb[12].mxu0 }
 0x475   : > { %v868_v43 = vmul.f32 %v1643_v41, %v861_v42  ;;  %v1477_v44 = vpop.f32.mrb[13].mxu0 }
 0x476   : > { %v864_v45 = vpop.f32.mrb[14].mxu0 }
 0x477   : > { %v1400_v47 = vpack.c.bf16 %v868_v43, %v868_v43  ;;  %v1478_v48 = vpop.f32.mrb[15].mxu0 }
 0x479   : > { %873 = vrot.lane.b32.xlu0 %v1400_v47, %s1931_s24 }
 0x47c   : > { %v980_v50 = vpop.f32.mrb[16].mxu0 }
 0x47d   : > { %v987_v52 = vmul.f32 %v1645_v49, %v980_v50  ;;  %v1489_v53 = vpop.f32.mrb[17].mxu0 }
 0x47e   : > { %v983_v54 = vpop.f32.mrb[18].mxu0 }
 0x47f   : > { %v1401_v56 = vpack.c.bf16 %v987_v52, %v987_v52  ;;  %v1490_v57 = vpop.f32.mrb[19].mxu0 }
 0x481   : > { %992 = vrot.lane.b32.xlu1 %v1401_v56, %s1932_s16 }
 0x484   : > { %v1099_v59 = vpop.f32.mrb[20].mxu0 }
 0x485   : > { %v1106_v60 = vmul.f32 %v1647_v58, %v1099_v59  ;;  %v1501_v61 = vpop.f32.mrb[21].mxu0 }
 0x486   : > { %v1102_v62 = vpop.f32.mrb[22].mxu0 }
 0x487   : > { %v1402_v63 = vpack.c.bf16 %v1106_v60, %v1106_v60  ;;  %v1502_v1 = vpop.f32.mrb[23].mxu0 }
 0x489   : > { %1111 = vrot.lane.b32.xlu1 %v1402_v63, %s1933_s27 }
 0x4eb   : > { %v874_v2 = vpop.permute.xlu0 %873 }
 0x4ec   : > { %877 = vst.msk [vmem:[#allocation2] sm:$0xf] %vm876_vm6, %v874_v2 }
 0x4f3   : > { %v993_v3 = vpop.permute.xlu1 %992 }
 0x4f4   : > { %996 = vst.msk [vmem:[#allocation2] sm:$0xf] %vm995_vm7, %v993_v3 }
 0x4fb   : > { %v1112_v0 = vpop.permute.xlu1 %1111 }
 0x4fc   : > { %1115 = vst.msk [vmem:[#allocation2] sm:$0xf] %vm1114_vm8, %v1112_v0 }
 0x503   : > { %v1116_v4 = vld [vmem:[#allocation2] sm:$0xf] }
 0x504   : > { %1508 = vmatmul.mubr.msk.bf16.vlgmr.msra.gmra.mrb[20].mxu1 %vm473_vm1, %v1116_v4 }
 0x5d7   : > { %v1177_v6 = vpop.f32.mrb[20].mxu1 }
 0x5d8   : > { %v1178_v7 = vadd.f32 %v1392_v5, %v1177_v6  ;;  %v1509_v8 = vpop.f32.mrb[21].mxu1 }
 0x5d9   : > { %v1180_v9 = vpop.f32.mrb[22].mxu1 }
 0x5da   : > { %v1510_v10 = vpop.f32.mrb[23].mxu1  ;;  %1183 = vst.msk [vmem:[%s452_s30] sm:$0xff] %vm473_vm1, %v1178_v7 }
 0x5db   : > { %1835 = shalt.err (!%p1832_p12)
}
 0x5dc   : > { %s1836_s3 = scalar_lea.hbm %s2362_s26, 128  ;;  %s1840_s24 = scalar_lea.hbm %s2487_s20, 256 }
 0x5dd   : > { %p1837_p8 = scmp.ne.s32.totalorder %s2362_s26, %s1836_s3  ;;  %p1841_p5 = scmp.lt.u32.totalorder %s2362_s26, %s2487_s20 }
 0x5de   : > { %p1842_p9 = scmp.lt.u32.totalorder %s1840_s24, %s1836_s3  ;;  %p1844_p4 = scmp.lt.u32.totalorder %s1836_s3, %s2362_s26 }
 0x5df   : > { %p1838_p11 = pnand %p1837_p8, %p2488_p7 }
 0x5e0   : > { %p1843_p2 = por %p1842_p9, %p1841_p5 }
 0x5e1   : > { %p1839_p10 = pneg %p1838_p11 }
 0x5e2   : > { %p1845_p3 = por %p1844_p4, %p1843_p2 }
 0x5e4   : > { %p1846_p1 = pnand %p1845_p3, %p1839_p10 }
 0x5e6   : > { %1849 = shalt.err (!%p1846_p1)
}
 0x5e7   : > { %1529 = dma.vmem_to_hbm [thread:$0]  (%p2488_p7), %s2364_s25, 128, %s2362_s26, %s1185_s11  }
 0x5e8 PF: > { %s2489_s27 = sld [smem:[#allocation20_spill]]  ;;  %s2490_s19 = sld [smem:[#allocation24_spill]] }
 0x5e9   : > { %s2491_s17 = sld [smem:[#allocation23_spill]] }
 0x5ee   : > { %s1211_s22 = sand.u32 1, %s2489_s27   ;;  %p2492_p13 = scmp.ne.s32.totalorder %s2490_s19, 0 }
 0x5ef   : > { %p2493_p6 = scmp.ge.s32.totalorder %s2491_s17, 2  ;;  %s1212_s8 = scalar_lea.sflag [#allocation5], %s1211_s22 }
 0x5f1   : > { %p1552_p0 = pnand %p2493_p6, %p2492_p13 }
 0x5f3   : > { %1891 = dma.done.wait (!%p1552_p0), %s1212_s8, 128  }
 0x5f4   : > { %1893 = vsyncadd (!%p1552_p0), %s1212_s8, 4294967168  ;;  %s29_s10 = sadd.s32 1, %s2491_s17   ;;  %s2494_s23 = sld [smem:[#allocation27_spill]] }
 0x5f5   : > { %p26_p12 = scmp.ge.s32.totalorder %s29_s10, 4   ;;  %s2495_s30 = sld [smem:[#allocation22_spill]] }
 0x5f6   : > { %s2496_s9 = sld [smem:[#allocation25_spill]]  ;;  %s2497_s27 = smov %s1900_s28 }
 0x5f7   : > { %s2498_s28 = smov %s1904_s29  ;;  %28 = sbr.rel (!%p26_p12) target bundleno = 15 (0xf), region = 133 }
 0x5fa   : > { %s2499_s29 = smov %s2494_s23 }
 0x5fe   :  { %1217 = vsyncpa [#allocation4], 1 }
 0x5ff   :  { %1219 = vsyncpa [#allocation4 + $0x1], 1 }
 0x600   :  { %1220 = vsyncpa [#allocation7], 1 }
 0x601   :  { %1222 = vsyncpa [#allocation7 + $0x1], 1 }
 0x602   :  { %1223 = vsyncpa [#allocation10], 1 }
 0x603   :  { %1224 = vsyncpa [#allocation13], 1 }
 0x604   :  { %1225 = vsyncpa [#allocation5], 1 }
 0x605   :  { %1227 = vsyncpa [#allocation5 + $0x1], 1 }

</bundles_post_ra>
